<compile_context>
chip_gen: v6e
topology: v6e:2x2x1
jax: 0.10.0
libtpu: 0.0.40
codegen_flags: <defaults>
</compile_context>

<pallas_src>
import functools

import jax
import jax.numpy as jnp
import numpy as np
from jax.experimental import pallas as pl
from jax.experimental.pallas import tpu as pltpu

# nuScenes-lidarseg 16-class label set (config['dataset'] == 'nuscenes').
CLASSES_NUSCENES = [
    "barrier", "bicycle", "bus", "car", "construction_vehicle", "motorcycle",
    "pedestrian", "traffic_cone", "trailer", "truck", "driveable_surface",
    "other_flat", "sidewalk", "terrain", "manmade", "vegetation",
]
UNSEEN_CLASSES = ["motorcycle", "trailer", "terrain", "traffic_cone"]
UNSEEN_IDX = tuple(CLASSES_NUSCENES.index(c) for c in UNSEEN_CLASSES)  # (5, 8, 13, 7)
NUM_CLASSES = len(CLASSES_NUSCENES)                                    # 16
IGNORE_INDEX = -100

_LANES = 128
_GROUPS = _LANES // NUM_CLASSES        # 8 samples packed per 128-lane row


def _build_bmat():
    """Constant (128, 256) block-diagonal 0/1 matrix for the MXU segmented sums.

    Columns [0, 128):    per-sample (16-lane group) sum of exp  -> softmax denominator
    Columns [128, 256):  per-sample sum of exp over *seen* class lanes
    """
    b = np.zeros((_LANES, 2 * _LANES), np.float32)
    blk_all = np.ones((NUM_CLASSES, NUM_CLASSES), np.float32)
    blk_seen = np.ones((NUM_CLASSES, NUM_CLASSES), np.float32)
    for u in UNSEEN_IDX:
        blk_seen[u, :] = 0.0                       # drop unseen-class contributions
    for g in range(_GROUPS):
        sl = slice(g * NUM_CLASSES, (g + 1) * NUM_CLASSES)
        b[sl, sl] = blk_all
        b[sl, _LANES + g * NUM_CLASSES:_LANES + (g + 1) * NUM_CLASSES] = blk_seen
    return b


_BMAT = _build_bmat()


def _loss_kernel(probas_ref, code_ref, bmat_ref, out_ref, *,
                 chunk_rows, num_chunks, bf16_stabilizer):
    step = pl.program_id(1)

    # out_ref (4, 128) is the resident accumulator across the "arbitrary" axis.
    @pl.when(step == 0)
    def _():
        out_ref[...] = jnp.zeros_like(out_ref)

    # XOR-hypercube stage masks for the per-sample (16-lane) max all-reduce.
    # Derived from a single (1,128) iota so the tree is correct for either
    # pltpu.roll direction convention; cost is a handful of (1,128) ops/step.
    lane = jax.lax.broadcasted_iota(jnp.int32, (1, _LANES), 1)
    stages = []
    s = 1
    while s < NUM_CLASSES:
        src = pltpu.roll(lane, shift=s, axis=1)     # actual source lane of roll-by-s
        stages.append((s, src == (lane ^ s)))       # roll-by-s delivers the XOR partner?
        s *= 2

    bmat = bmat_ref[...]                            # (128, 256), VMEM-resident constant

    def chunk(c, carry):
        start = c * chunk_rows
        if not isinstance(start, int):
            start = pl.multiple_of(start, 32)
        x = probas_ref[pl.ds(start, chunk_rows), :].astype(jnp.float32)   # (cr, 128)
        code = code_ref[pl.ds(start, chunk_rows), :].astype(jnp.int32)    # (cr, 128)

        # per-sample max over its 16 class lanes, broadcast back to those lanes.
        # bf16 halves the roll-tree vregs on v6e/v7x; the stabilizer need not be
        # exact (logsumexp adds it back), so this is accuracy-neutral.
        v = x.astype(jnp.bfloat16) if bf16_stabilizer else x
        for shift, use_a in stages:
            a = pltpu.roll(v, shift=shift, axis=1)
            b = pltpu.roll(v, shift=_LANES - shift, axis=1)
            v = jnp.maximum(v, jnp.where(use_a, a, b))
        gmax = v.astype(jnp.float32)

        ez = jnp.exp(x - gmax)

        # segmented sums on the otherwise idle MXU (replaces the second roll tree
        # and the masked seen-class reduction).
        sums = jnp.dot(ez, bmat, preferred_element_type=jnp.float32)      # (cr, 256)
        denom = sums[:, :_LANES]          # per-sample sum(exp), broadcast to lanes
        seen_sum = sums[:, _LANES:]       # per-sample seen-class sum(exp)

        lse = gmax + jnp.log(denom)       # per-sample logsumexp (broadcast)
        inv_denom = pl.reciprocal(denom, approx=True)

        is_lab = code == 1                # label lane of each seen sample (1 lane/sample)
        is_uns = code == 2                # single marker lane per unseen sample

        ce = jnp.where(is_lab, lse - x, 0.0)                  # -log softmax[label]
        sp = jnp.where(is_uns, seen_sum * inv_denom, 0.0)     # seen-class prob mass

        # per-lane partial sums, accumulated row-by-row into the resident output
        out_ref[0:1, :] += jnp.sum(ce, axis=0, keepdims=True)
        out_ref[1:2, :] += jnp.sum(is_lab.astype(jnp.float32), axis=0, keepdims=True)
        out_ref[2:3, :] += jnp.sum(sp, axis=0, keepdims=True)
        out_ref[3:4, :] += jnp.sum(is_uns.astype(jnp.float32), axis=0, keepdims=True)
        return carry

    if num_chunks == 1:
        chunk(0, 0)
    else:
        jax.lax.fori_loop(0, num_chunks, chunk, 0)


def _round_up(x, m):
    return ((x + m - 1) // m) * m


def _device_kind():
    try:
        return jax.devices()[0].device_kind.lower()
    except Exception:
        return ""


def unknown_aware_infonce_loss(probas, labels, *,
                               ignore_index=IGNORE_INDEX,
                               tile_rows=4096,      # packed rows (x8 samples) per DMA block
                               chunk_rows=None,     # in-kernel compute chunk (default 1024)
                               num_par=None,        # leading "parallel" grid axis
                               bf16_stabilizer=None):
    """probas: (N, 16) logits (f32 or bf16); labels: (N,) int class ids / ignore_index."""
    n, c = probas.shape
    assert c == NUM_CLASSES and _LANES % c == 0, \
        "kernel is specialized to the 16-class nuScenes head"
    # TODO(synk): KITTI (C=19) needs a different lane packing (19 does not divide 128).

    kind = _device_kind()
    if num_par is None:
        num_par = 2 if "v7" in kind else 1                    # only v7x has 2 TCs / chip
    if bf16_stabilizer is None:
        bf16_stabilizer = ("v6" in kind) or ("v7" in kind)    # chips with bf16 VPU

    rows = -(-n // _GROUPS)                                   # packed 128-lane rows
    rows_per_par = -(-rows // num_par)

    # Block sizing: large DMA blocks amortize the ~0.35us per-step overhead; the
    # in-kernel chunk loop bounds VMEM-resident temporaries to ~a few * cr * 512B.
    tr = max(1, min(tile_rows, rows_per_par))
    cr = min(1024 if chunk_rows is None else chunk_rows, tr)
    cr = max(32, _round_up(cr, 32))                           # int8/bf16-safe sublane align
    tr = _round_up(tr, cr)
    num_chunks = tr // cr

    rows_p = _round_up(rows, num_par * tr)
    steps = rows_p // (num_par * tr)
    n_pad = rows_p * _GROUPS

    labels = labels.astype(jnp.int32)
    if n_pad != n:
        probas = jnp.pad(probas, ((0, n_pad - n), (0, 0)))
        labels = jnp.pad(labels, (0, n_pad - n), constant_values=ignore_index)

    # Per-lane int8 "codes", built once in XLA.  Lane-dense in HBM and VMEM (no
    # 8->128 lane padding of the old label block, no float label round-trip).
    #   1 -> the label lane of a seen sample
    #   2 -> class-0 lane of an unseen sample (marker: mass/count taken once)
    #   0 -> everything else (ignore_index / padding)
    unseen = jnp.zeros(labels.shape, jnp.bool_)
    for u in UNSEEN_IDX:
        unseen = unseen | (labels == u)
    seen = (labels != ignore_index) & jnp.logical_not(unseen)
    cls = jnp.arange(c, dtype=jnp.int32)
    code = jnp.where(seen[:, None] & (cls[None, :] == labels[:, None]), 1, 0)
    code = jnp.where(unseen[:, None] & (cls[None, :] == 0), 2, code).astype(jnp.int8)

    xp = probas.reshape(rows_p, _LANES)            # (rows, 128): contiguous -> free
    cp = code.reshape(rows_p, _LANES)              # (rows, 128) int8, lane-dense
    bmat = jnp.asarray(_BMAT)                      # (128, 256) constant, VMEM-resident

    kernel = functools.partial(_loss_kernel,
                               chunk_rows=cr,
                               num_chunks=num_chunks,
                               bf16_stabilizer=bf16_stabilizer)

    out = pl.pallas_call(
        kernel,
        out_shape=jax.ShapeDtypeStruct((num_par * 4, _LANES), jnp.float32),
        grid_spec=pltpu.PrefetchScalarGridSpec(
            num_scalar_prefetch=0,
            grid=(num_par, steps),
            in_specs=[
                pl.BlockSpec((tr, _LANES), lambda p, i: (p * steps + i, 0)),
                pl.BlockSpec((tr, _LANES), lambda p, i: (p * steps + i, 0)),
                pl.BlockSpec((_LANES, 2 * _LANES), lambda p, i: (0, 0)),  # fetched once
            ],
            out_specs=pl.BlockSpec((4, _LANES), lambda p, i: (p, 0)),
        ),
        compiler_params=pltpu.CompilerParams(
            dimension_semantics=("parallel", "arbitrary"),
            vmem_limit_bytes=32 * 1024 * 1024),
    )(xp, cp, bmat)

    # --- tiny epilogue in plain JAX --------------------------------------------
    sums = out.reshape(num_par, 4, _LANES).sum(axis=(0, 2))   # (4,)
    sum_ce, n_seen, sum_sp, n_unseen = sums[0], sums[1], sums[2], sums[3]
    loss1 = sum_ce / n_seen                        # NaN if no seen points (torch semantics)
    loss2 = jnp.where(n_unseen > 0, sum_sp / jnp.maximum(n_unseen, 1.0), 0.0)
    return loss1 + loss2


def _reference(probas, labels, ignore_index=IGNORE_INDEX):
    """Pure-JAX replica of the PyTorch forward for verification."""
    unseen_arr = jnp.array(UNSEEN_IDX, dtype=labels.dtype)
    labels = jnp.where(jnp.isin(labels, unseen_arr), -200, labels)
    seen = (labels != ignore_index) & (labels != -200)
    unseen = labels == -200

    logp = jax.nn.log_softmax(probas, axis=1)
    safe_lab = jnp.clip(labels, 0, probas.shape[1] - 1)
    ce = -jnp.take_along_axis(logp, safe_lab[:, None], axis=1)[:, 0]
    loss1 = jnp.sum(jnp.where(seen, ce, 0.0)) / jnp.sum(seen)

    p = jax.nn.softmax(probas, axis=1)
    seen_cols = jnp.array([i for i in range(NUM_CLASSES) if i not in UNSEEN_IDX])
    sp = jnp.sum(p[:, seen_cols], axis=1)
    n_unseen = jnp.sum(unseen)
    loss2 = jnp.where(n_unseen > 0,
                      jnp.sum(jnp.where(unseen, sp, 0.0)) / jnp.maximum(n_unseen, 1),
                      0.0)
    return loss1 + loss2


if __name__ == "__main__":
    key = jax.random.PRNGKey(0)
    k1, k2, k3 = jax.random.split(key, 3)

    N, C = 5000, NUM_CLASSES
    probas = 3.0 * jax.random.normal(k1, (N, C), dtype=jnp.float32)
    labels = jax.random.randint(k2, (N,), 0, C, dtype=jnp.int32)
    ignore_mask = jax.random.bernoulli(k3, 0.1, (N,))
    labels = jnp.where(ignore_mask, IGNORE_INDEX, labels)

    ref = jax.block_until_ready(_reference(probas, labels))

    # small tiles -> exercises padding and multi-step accumulation on the grid
    loss_a = jax.block_until_ready(
        unknown_aware_infonce_loss(probas, labels, tile_rows=128))
    assert jnp.allclose(loss_a, ref, atol=2e-3, rtol=2e-3), (loss_a, ref)

    # DMA block larger than the compute chunk -> exercises the in-kernel chunk loop
    loss_b = jax.block_until_ready(
        unknown_aware_infonce_loss(probas, labels, tile_rows=512, chunk_rows=128))
    assert jnp.allclose(loss_b, ref, atol=2e-3, rtol=2e-3), (loss_b, ref)

    # default configuration (auto num_par / bf16 stabilizer, large tiles)
    loss_c = jax.block_until_ready(unknown_aware_infonce_loss(probas, labels))
    assert jnp.allclose(loss_c, ref, atol=2e-3, rtol=2e-3), (loss_c, ref)

    # bf16 logits: bf16 DMA/VMEM, f32 math in-kernel (reference on the rounded input)
    probas_bf16 = probas.astype(jnp.bfloat16)
    ref_bf16 = jax.block_until_ready(
        _reference(probas_bf16.astype(jnp.float32), labels))
    loss_d = jax.block_until_ready(unknown_aware_infonce_loss(probas_bf16, labels))
    assert jnp.allclose(loss_d, ref_bf16, atol=2e-3, rtol=2e-3), (loss_d, ref_bf16)

    print("KERNEL_OK")
</pallas_src>

<mosaic_0001>
module attributes {stable_mosaic.version = 11 : i64} {
  func.func @_loss_kernel(%arg0: i32, %arg1: i32, %arg2: memref<128x128xf32, #tpu.memory_space<vmem>>, %arg3: memref<128x128xi8, #tpu.memory_space<vmem>>, %arg4: memref<128x256xf32, #tpu.memory_space<vmem>>, %arg5: memref<4x128xf32, #tpu.memory_space<vmem>>) attributes {dimension_semantics = [#tpu.dimension_semantics<parallel>, #tpu.dimension_semantics<arbitrary>], iteration_bounds = array<i64: 1, 5>, scalar_prefetch = 0 : i64, scratch_operands = 0 : i64, tpu.core_type = #tpu.core_type<tc>, window_params = [{transform_indices = @transform_0, window_bounds = array<i64: 128, 128>}, {transform_indices = @transform_1, window_bounds = array<i64: 128, 128>}, {pipeline_mode = #tpu.pipeline_mode<synchronous>, transform_indices = @transform_2, window_bounds = array<i64: 128, 256>}, {transform_indices = @transform_3, window_bounds = array<i64: 4, 128>}]} {
    %c0_i32 = arith.constant 0 : i32
    %0 = arith.cmpi eq, %arg1, %c0_i32 : i32
    %1 = arith.extui %0 : i1 to i32
    %c0_i32_0 = arith.constant 0 : i32
    %2 = arith.cmpi ne, %1, %c0_i32_0 : i32
    scf.if %2 {
      %cst_35 = arith.constant 0.000000e+00 : f32
      %90 = vector.broadcast %cst_35 : f32 to vector<4x128xf32>
      %c0_36 = arith.constant 0 : index
      %c0_37 = arith.constant 0 : index
      %91 = vector.load %arg5[%c0_36, %c0_37] : memref<4x128xf32, #tpu.memory_space<vmem>>, vector<4x128xf32>
      tpu.vector_store %arg5[%c0_36, %c0_37], %90 {strides = array<i32>} : memref<4x128xf32, #tpu.memory_space<vmem>>, vector<4x128xf32>,
    } else {
    }
    %3 = tpu.iota {dimensions = array<i32: 1>} : vector<1x128xi32>
    %c1_i32 = arith.constant 1 : i32
    %4 = tpu.dynamic_rotate %3 by %c1_i32 dim 1 : vector<1x128xi32>, i32 -> vector<1x128xi32>
    %c1_i32_1 = arith.constant 1 : i32
    %5 = vector.broadcast %c1_i32_1 : i32 to vector<1x128xi32>
    %6 = arith.xori %3, %5 : vector<1x128xi32>
    %7 = arith.cmpi eq, %4, %6 : vector<1x128xi32>
    %c2_i32 = arith.constant 2 : i32
    %8 = tpu.dynamic_rotate %3 by %c2_i32 dim 1 : vector<1x128xi32>, i32 -> vector<1x128xi32>
    %c2_i32_2 = arith.constant 2 : i32
    %9 = vector.broadcast %c2_i32_2 : i32 to vector<1x128xi32>
    %10 = arith.xori %3, %9 : vector<1x128xi32>
    %11 = arith.cmpi eq, %8, %10 : vector<1x128xi32>
    %c4_i32 = arith.constant 4 : i32
    %12 = tpu.dynamic_rotate %3 by %c4_i32 dim 1 : vector<1x128xi32>, i32 -> vector<1x128xi32>
    %c4_i32_3 = arith.constant 4 : i32
    %13 = vector.broadcast %c4_i32_3 : i32 to vector<1x128xi32>
    %14 = arith.xori %3, %13 : vector<1x128xi32>
    %15 = arith.cmpi eq, %12, %14 : vector<1x128xi32>
    %c8_i32 = arith.constant 8 : i32
    %16 = tpu.dynamic_rotate %3 by %c8_i32 dim 1 : vector<1x128xi32>, i32 -> vector<1x128xi32>
    %c8_i32_4 = arith.constant 8 : i32
    %17 = vector.broadcast %c8_i32_4 : i32 to vector<1x128xi32>
    %18 = arith.xori %3, %17 : vector<1x128xi32>
    %19 = arith.cmpi eq, %16, %18 : vector<1x128xi32>
    %c0 = arith.constant 0 : index
    %c0_5 = arith.constant 0 : index
    %20 = vector.load %arg4[%c0, %c0_5] : memref<128x256xf32, #tpu.memory_space<vmem>>, vector<128x256xf32>
    %c0_6 = arith.constant 0 : index
    %c0_7 = arith.constant 0 : index
    %21 = vector.load %arg2[%c0_6, %c0_7] : memref<128x128xf32, #tpu.memory_space<vmem>>, vector<128x128xf32>
    %c0_8 = arith.constant 0 : index
    %c0_9 = arith.constant 0 : index
    %22 = vector.load %arg3[%c0_8, %c0_9] : memref<128x128xi8, #tpu.memory_space<vmem>>, vector<128x128xi8>
    %23 = arith.extsi %22 : vector<128x128xi8> to vector<128x128xi32>
    %c1_i32_10 = arith.constant 1 : i32
    %24 = tpu.dynamic_rotate %21 by %c1_i32_10 dim 1 : vector<128x128xf32>, i32 -> vector<128x128xf32>
    %c127_i32 = arith.constant 127 : i32
    %25 = tpu.dynamic_rotate %21 by %c127_i32 dim 1 : vector<128x128xf32>, i32 -> vector<128x128xf32>
    %26 = vector.shape_cast %7 : vector<1x128xi1> to vector<1x128xi1>
    %27 = vector.broadcast %26 : vector<1x128xi1> to vector<128x128xi1>
    %28 = arith.select %27, %24, %25 : vector<128x128xi1>, vector<128x128xf32>
    %29 = arith.maximumf %21, %28 : vector<128x128xf32>
    %c2_i32_11 = arith.constant 2 : i32
    %30 = tpu.dynamic_rotate %29 by %c2_i32_11 dim 1 : vector<128x128xf32>, i32 -> vector<128x128xf32>
    %c126_i32 = arith.constant 126 : i32
    %31 = tpu.dynamic_rotate %29 by %c126_i32 dim 1 : vector<128x128xf32>, i32 -> vector<128x128xf32>
    %32 = vector.shape_cast %11 : vector<1x128xi1> to vector<1x128xi1>
    %33 = vector.broadcast %32 : vector<1x128xi1> to vector<128x128xi1>
    %34 = arith.select %33, %30, %31 : vector<128x128xi1>, vector<128x128xf32>
    %35 = arith.maximumf %29, %34 : vector<128x128xf32>
    %c4_i32_12 = arith.constant 4 : i32
    %36 = tpu.dynamic_rotate %35 by %c4_i32_12 dim 1 : vector<128x128xf32>, i32 -> vector<128x128xf32>
    %c124_i32 = arith.constant 124 : i32
    %37 = tpu.dynamic_rotate %35 by %c124_i32 dim 1 : vector<128x128xf32>, i32 -> vector<128x128xf32>
    %38 = vector.shape_cast %15 : vector<1x128xi1> to vector<1x128xi1>
    %39 = vector.broadcast %38 : vector<1x128xi1> to vector<128x128xi1>
    %40 = arith.select %39, %36, %37 : vector<128x128xi1>, vector<128x128xf32>
    %41 = arith.maximumf %35, %40 : vector<128x128xf32>
    %c8_i32_13 = arith.constant 8 : i32
    %42 = tpu.dynamic_rotate %41 by %c8_i32_13 dim 1 : vector<128x128xf32>, i32 -> vector<128x128xf32>
    %c120_i32 = arith.constant 120 : i32
    %43 = tpu.dynamic_rotate %41 by %c120_i32 dim 1 : vector<128x128xf32>, i32 -> vector<128x128xf32>
    %44 = vector.shape_cast %19 : vector<1x128xi1> to vector<1x128xi1>
    %45 = vector.broadcast %44 : vector<1x128xi1> to vector<128x128xi1>
    %46 = arith.select %45, %42, %43 : vector<128x128xi1>, vector<128x128xf32>
    %47 = arith.maximumf %41, %46 : vector<128x128xf32>
    %48 = arith.subf %21, %47 : vector<128x128xf32>
    %49 = math.exp %48 : vector<128x128xf32>
    %cst = arith.constant dense<0.000000e+00> : vector<128x256xf32>
    %50 = tpu.matmul %49, %20, %cst {dimension_numbers = #tpu.dot_dimension_numbers<[1], [0], [0], [1], [0, 0, 1, 1], [], []>} : vector<128x128xf32>, vector<128x256xf32>, vector<128x256xf32> -> vector<128x256xf32>
    %51 = vector.extract_strided_slice %50 {offsets = [0, 0], sizes = [128, 128], strides = [1, 1]} : vector<128x256xf32> to vector<128x128xf32>
    %52 = vector.extract_strided_slice %50 {offsets = [0, 128], sizes = [128, 128], strides = [1, 1]} : vector<128x256xf32> to vector<128x128xf32>
    %53 = math.log %51 : vector<128x128xf32>
    %54 = arith.addf %47, %53 : vector<128x128xf32>
    %55 = tpu.reciprocal %51 {approx = true} : vector<128x128xf32> -> vector<128x128xf32>
    %c1_i32_14 = arith.constant 1 : i32
    %56 = vector.broadcast %c1_i32_14 : i32 to vector<128x128xi32>
    %57 = arith.cmpi eq, %23, %56 : vector<128x128xi32>
    %c2_i32_15 = arith.constant 2 : i32
    %58 = vector.broadcast %c2_i32_15 : i32 to vector<128x128xi32>
    %59 = arith.cmpi eq, %23, %58 : vector<128x128xi32>
    %60 = arith.subf %54, %21 : vector<128x128xf32>
    %cst_16 = arith.constant 0.000000e+00 : f32
    %61 = vector.broadcast %cst_16 : f32 to vector<128x128xf32>
    %62 = arith.select %57, %60, %61 : vector<128x128xi1>, vector<128x128xf32>
    %63 = arith.mulf %52, %55 : vector<128x128xf32>
    %cst_17 = arith.constant 0.000000e+00 : f32
    %64 = vector.broadcast %cst_17 : f32 to vector<128x128xf32>
    %65 = arith.select %59, %63, %64 : vector<128x128xi1>, vector<128x128xf32>
    %c0_18 = arith.constant 0 : index
    %c0_19 = arith.constant 0 : index
    %66 = vector.load %arg5[%c0_18, %c0_19] : memref<4x128xf32, #tpu.memory_space<vmem>>, vector<1x128xf32>
    %cst_20 = arith.constant dense<0.000000e+00> : vector<128xf32>
    %67 = vector.multi_reduction <add>, %62, %cst_20 [0] : vector<128x128xf32> to vector<128xf32>
    %68 = vector.shape_cast %67 : vector<128xf32> to vector<1x128xf32>
    %69 = arith.addf %66, %68 : vector<1x128xf32>
    %c0_21 = arith.constant 0 : index
    %c0_22 = arith.constant 0 : index
    %70 = vector.load %arg5[%c0_21, %c0_22] : memref<4x128xf32, #tpu.memory_space<vmem>>, vector<1x128xf32>
    tpu.vector_store %arg5[%c0_21, %c0_22], %69 {strides = array<i32>} : memref<4x128xf32, #tpu.memory_space<vmem>>, vector<1x128xf32>,
    %c1 = arith.constant 1 : index
    %c0_23 = arith.constant 0 : index
    %71 = vector.load %arg5[%c1, %c0_23] : memref<4x128xf32, #tpu.memory_space<vmem>>, vector<1x128xf32>
    %72 = arith.extui %57 : vector<128x128xi1> to vector<128x128xi32>
    %73 = arith.sitofp %72 : vector<128x128xi32> to vector<128x128xf32>
    %cst_24 = arith.constant dense<0.000000e+00> : vector<128xf32>
    %74 = vector.multi_reduction <add>, %73, %cst_24 [0] : vector<128x128xf32> to vector<128xf32>
    %75 = vector.shape_cast %74 : vector<128xf32> to vector<1x128xf32>
    %76 = arith.addf %71, %75 : vector<1x128xf32>
    %c1_25 = arith.constant 1 : index
    %c0_26 = arith.constant 0 : index
    %77 = vector.load %arg5[%c1_25, %c0_26] : memref<4x128xf32, #tpu.memory_space<vmem>>, vector<1x128xf32>
    tpu.vector_store %arg5[%c1_25, %c0_26], %76 {strides = array<i32>} : memref<4x128xf32, #tpu.memory_space<vmem>>, vector<1x128xf32>,
    %c2 = arith.constant 2 : index
    %c0_27 = arith.constant 0 : index
    %78 = vector.load %arg5[%c2, %c0_27] : memref<4x128xf32, #tpu.memory_space<vmem>>, vector<1x128xf32>
    %cst_28 = arith.constant dense<0.000000e+00> : vector<128xf32>
    %79 = vector.multi_reduction <add>, %65, %cst_28 [0] : vector<128x128xf32> to vector<128xf32>
    %80 = vector.shape_cast %79 : vector<128xf32> to vector<1x128xf32>
    %81 = arith.addf %78, %80 : vector<1x128xf32>
    %c2_29 = arith.constant 2 : index
    %c0_30 = arith.constant 0 : index
    %82 = vector.load %arg5[%c2_29, %c0_30] : memref<4x128xf32, #tpu.memory_space<vmem>>, vector<1x128xf32>
    tpu.vector_store %arg5[%c2_29, %c0_30], %81 {strides = array<i32>} : memref<4x128xf32, #tpu.memory_space<vmem>>, vector<1x128xf32>,
    %c3 = arith.constant 3 : index
    %c0_31 = arith.constant 0 : index
    %83 = vector.load %arg5[%c3, %c0_31] : memref<4x128xf32, #tpu.memory_space<vmem>>, vector<1x128xf32>
    %84 = arith.extui %59 : vector<128x128xi1> to vector<128x128xi32>
    %85 = arith.sitofp %84 : vector<128x128xi32> to vector<128x128xf32>
    %cst_32 = arith.constant dense<0.000000e+00> : vector<128xf32>
    %86 = vector.multi_reduction <add>, %85, %cst_32 [0] : vector<128x128xf32> to vector<128xf32>
    %87 = vector.shape_cast %86 : vector<128xf32> to vector<1x128xf32>
    %88 = arith.addf %83, %87 : vector<1x128xf32>
    %c3_33 = arith.constant 3 : index
    %c0_34 = arith.constant 0 : index
    %89 = vector.load %arg5[%c3_33, %c0_34] : memref<4x128xf32, #tpu.memory_space<vmem>>, vector<1x128xf32>
    tpu.vector_store %arg5[%c3_33, %c0_34], %88 {strides = array<i32>} : memref<4x128xf32, #tpu.memory_space<vmem>>, vector<1x128xf32>,
    return
  }
  func.func @transform_0(%arg0: i32, %arg1: i32) -> (i32, i32) {
    %c5_i32 = arith.constant 5 : i32
    %0 = arith.muli %arg0, %c5_i32 : i32
    %1 = arith.addi %0, %arg1 : i32
    %c0_i32 = arith.constant 0 : i32
    %c0_i32_0 = arith.constant 0 : i32
    return %1, %c0_i32 : i32, i32
  }
  func.func @transform_1(%arg0: i32, %arg1: i32) -> (i32, i32) {
    %c5_i32 = arith.constant 5 : i32
    %0 = arith.muli %arg0, %c5_i32 : i32
    %1 = arith.addi %0, %arg1 : i32
    %c0_i32 = arith.constant 0 : i32
    %c0_i32_0 = arith.constant 0 : i32
    return %1, %c0_i32 : i32, i32
  }
  func.func @transform_2(%arg0: i32, %arg1: i32) -> (i32, i32) {
    %c0_i32 = arith.constant 0 : i32
    %c0_i32_0 = arith.constant 0 : i32
    %c0_i32_1 = arith.constant 0 : i32
    return %c0_i32, %c0_i32_0 : i32, i32
  }
  func.func @transform_3(%arg0: i32, %arg1: i32) -> (i32, i32) {
    %c0_i32 = arith.constant 0 : i32
    %c0_i32_0 = arith.constant 0 : i32
    return %arg0, %c0_i32 : i32, i32
  }
}

</mosaic_0001>

<bundles_post_ra>
// kernel: tpu_custom_call.1
= control target key start
LH: loop header
LB: loop body
LE: loop exit
PB: predicated region body
PF: predicated region fallthrough
CT: control target
= control target key end

     0   :  { %s3153_s0 = inlined_call_operand.hbm [shape: f32[640,128], index: 0, kind: input, shape index: {}]   ;;  %s3154_s1 = inlined_call_operand.hbm [shape: s8[640,128], index: 1, kind: input, shape index: {}]   ;;  %s3155_s2 = inlined_call_operand.hbm [shape: f32[128,256], index: 2, kind: input, shape index: {}]   ;;  %s3156_s3 = inlined_call_operand.hbm [shape: f32[4,128], index: 3, kind: output, shape index: {}]  }
   0x1   :  { %3198 = sst [smem:[#allocation38_spill]] %s3153_s0 }
   0x2   :  { %3199 = sst [smem:[#allocation39_spill]] %s3155_s2 }
   0x3   :  { %8 = vsyncpa [#allocation3], 0 }
   0x4   :  { %10 = vsyncpa [#allocation3 + $0x1], 0 }
   0x5   :  { %11 = vsyncpa [#allocation6], 0 }
   0x6   :  { %13 = vsyncpa [#allocation6 + $0x1], 0 }
   0x7   :  { %14 = vsyncpa [#allocation4], 0  ;;  %s1899_s12 = smov 0   ;;  %s1901_s13 = smov 0  }
   0x8   :  { %s1903_s14 = smov 0   ;;  %s1905_s15 = smov 0  }
   0x9   :  { %s1907_s16 = smov 0   ;;  %s1909_s17 = smov 0  }
   0xa LB: > { %s1928_s18 = sadd.s32 4294967295, %s1858_s17   ;;  %p56_p0 = scmp.ne.s32.totalorder %s1842_s13, %s1838_s12  ;;  %s1858_s17 = sphi %s1909_s17, %s20_s17   ;;  %s1854_s16 = sphi %s1907_s16, %s3348_s16   ;;  %s1850_s15 = sphi %s1905_s15, %s3347_s15   ;;  %s1846_s14 = sphi %s1903_s14, %s3346_s14   ;;  %s1842_s13 = sphi %s1901_s13, %s3345_s13   ;;  %s1838_s12 = sphi %s1899_s12, %s3344_s12  }
   0xb   : > { %p57_p1 = scmp.eq.s32.totalorder %s1928_s18, 0  ;;  %p1401_p2 = scmp.ge.s32.totalorder %s1858_s17, 1 }
   0xc   : > { %p144_p3 = scmp.lt.s32.totalorder %s1858_s17, 6  ;;  %s1860_s21 = smov [#allocation7]  }
   0xd   : > { %p1936_p4 = por %p57_p1, %p56_p0  ;;  %s156_s22 = sshll.u32 %s1860_s21, 4  ;;  %s157_s22 = int_to_ptr.vmem [resolvable:$true] %s156_s22 }
   0xe   : > { %p1940_p5 = pnand %p1401_p2, %p144_p3  ;;  %s29_s24 = sadd.s32 1, %s1854_s16 }
   0xf   : > { %s1701_s25 = scalar_lea.vmem %s157_s22, 4096  ;;  %p1709_p12 = scmp.lt.s32.totalorder %s157_s22, %s157_s22 }
  0x10   : > { %p1497_p6 = pneg %p1940_p5  ;;  %p1702_p9 = scmp.ne.s32.totalorder %s157_s22, %s1701_s25 }
  0x11   : > { %p1710_p13 = scmp.lt.s32.totalorder %s1701_s25, %s1701_s25 }
  0x12   : > { %p1948_p7 = pnand %p1497_p6, %p57_p1 }
  0x13   : > { %p1711_p0 = por %p1710_p13, %p1709_p12 }
  0x14   : > { %p1692_p8 = pneg %p1948_p7 }
  0x16   : > { %p1704_p10 = pnand %p1702_p9, %p1692_p8 }
  0x18   : > { %p1705_p11 = pneg %p1704_p10 }
  0x1a   : > { %p1712_p2 = pnand %p1711_p0, %p1705_p11 }
  0x1c   : > { %1715 = shalt.err (!%p1712_p2)
}
  0x1d   : > { %s1861_s26 = smov 256   ;;  %s1862_s27 = smov 16  }
  0x1e   : > { %s3203_s2 = sld [smem:[#allocation39_spill]]  ;;  %p30_p3 = scmp.ge.s32.totalorder %s29_s24, 5 }
  0x1f   : > { %s43_s30 = sadd.s32 1, %s1846_s14  ;;  %p50_p6 = scmp.ne.s32.totalorder %s1846_s14, %s1842_s13 }
  0x20   : > { %p51_p8 = scmp.eq.s32.totalorder %s1858_s17, 0  ;;  %s3350_s24 = smov (%p30_p3, %s29_s24), 0 }
  0x21   : > { %p1509_p10 = scmp.lt.s32.totalorder %s1858_s17, 5  ;;  %s40_s4 = ssub.s32 %s1854_s16, %s3350_s24 }
  0x22   : > { %p52_p9 = por %p51_p8, %p50_p6  ;;  %s1970_s5 = sand.u32 1, %s1846_s14  }
  0x23   : > { %p41_p11 = scmp.eq.s32.totalorder %s40_s4, 0  ;;  %s1404_s6 = sshll.u32 %s1970_s5, 7 }
  0x24   : > { %1500 = dma.hbm_to_vmem [thread:$0]  (!%p1948_p7), %s3203_s2, 4096, %s157_s22, [#allocation6], %s1861_s26, %s1861_s26, %s1862_s27  }
  0x25   : > { %s1451_s7 = sshll.u32 %s1854_s16, 11  ;;  %s3204_s0 = sld [smem:[#allocation38_spill]] }
  0x26   : > { %s1975_s8 = scalar_select %p41_p11, %s1846_s14, %s43_s30  }
  0x27   : > { %s174_s12 = scalar_lea.vmem [#allocation2], %s1404_s6  ;;  %p1980_p7 = pnand %p1509_p10, %p52_p9 }
  0x28   : > { %s183_s21 = sshll.u32 %s174_s12, 4  ;;  %s171_s23 = scalar_lea.sflag [#allocation3], %s1970_s5  ;;  %s184_s21 = int_to_ptr.vmem [resolvable:$true] %s183_s21 }
  0x29   : > { %p1718_p12 = pneg %p1980_p7  ;;  %s1729_s25 = scalar_lea.vmem %s184_s21, 2048 }
  0x2a   : > { %p1730_p13 = scmp.ne.s32.totalorder %s184_s21, %s1729_s25  ;;  %s1863_s26 = smov [#allocation2]  }
  0x2b   : > { %s182_s11 = scalar_lea.hbm %s3204_s0, %s1451_s7  ;;  %s1734_s27 = sshll.u32 %s1863_s26, 4  ;;  %s1735_s27 = int_to_ptr.vmem [resolvable:$false] %s1734_s27 }
  0x2c   : > { %p1732_p0 = pnand %p1730_p13, %p1718_p12  ;;  %s1736_s28 = scalar_lea.vmem %s1735_s27, 4096 }
  0x2d   : > { %p1737_p3 = scmp.lt.s32.totalorder %s184_s21, %s1735_s27  ;;  %p1738_p6 = scmp.lt.s32.totalorder %s1736_s28, %s1729_s25 }
  0x2e   : > { %p1733_p2 = pneg %p1732_p0 }
  0x2f   : > { %p1739_p8 = por %p1738_p6, %p1737_p3 }
  0x31   : > { %p1740_p9 = pnand %p1739_p8, %p1733_p2 }
  0x33   : > { %1743 = shalt.err (!%p1740_p9)
}
  0x34   : > { %s1864_s29 = smov 128   ;;  %s1865_s30 = smov 8  }
  0x35   : > { %1504 = dma.hbm_to_vmem [thread:$0]  (!%p1980_p7), %s182_s11, 2048, %s184_s21, %s171_s23, %s1864_s29, %s1864_s29, %s1865_s30  }
  0x36   : > { %s193_s4 = sand.u32 1, %s1858_s17   ;;  %s1407_s6 = sshll.u32 %s1970_s5, 5 }
  0x37   : > { %s1452_s7 = sshll.u32 %s1854_s16, 9  ;;  %s197_s9 = scalar_lea.vmem [#allocation5], %s1407_s6 }
  0x38   : > { %s206_s10 = sshll.u32 %s197_s9, 4  ;;  %s205_s25 = scalar_lea.hbm %s3154_s1, %s1452_s7  ;;  %s207_s10 = int_to_ptr.vmem [resolvable:$true] %s206_s10 }
  0x39   : > { %s194_s27 = scalar_lea.sflag [#allocation6], %s193_s4  ;;  %s1757_s28 = scalar_lea.vmem %s207_s10, 512 }
  0x3a   : > { %p1758_p10 = scmp.ne.s32.totalorder %s207_s10, %s1757_s28  ;;  %s1866_s0 = smov [#allocation5]  }
  0x3b   : > { %s1762_s2 = sshll.u32 %s1866_s0, 4  ;;  %s1763_s2 = int_to_ptr.vmem [resolvable:$false] %s1762_s2 }
  0x3c   : > { %p1760_p11 = pnand %p1758_p10, %p1718_p12  ;;  %s1764_s11 = scalar_lea.vmem %s1763_s2, 1024 }
  0x3d   : > { %p1765_p0 = scmp.lt.s32.totalorder %s207_s10, %s1763_s2  ;;  %p1766_p2 = scmp.lt.s32.totalorder %s1764_s11, %s1757_s28 }
  0x3e   : > { %p1761_p13 = pneg %p1760_p11 }
  0x3f   : > { %p1767_p3 = por %p1766_p2, %p1765_p0 }
  0x41   : > { %p1768_p6 = pnand %p1767_p3, %p1761_p13 }
  0x43   : > { %1771 = shalt.err (!%p1768_p6)
}
  0x44   : > { %1507 = dma.hbm_to_vmem [thread:$0]  (!%p1980_p7), %s205_s25, 512, %s207_s10, %s194_s27, %s1864_s29, %s1864_s29, %s1865_s30  }
  0x45   : > { %218 = sbr.rel (%p1940_p5) target bundleno = 896 (0x380), region = 32 }
  0x4a   : > { %s220_s5 = sand.u32 1, %s1842_s13  }
  0x4b   : > { %s1411_s21 = sshll.u32 %s220_s5, 7  ;;  %s221_s23 = scalar_lea.sflag [#allocation3], %s220_s5 }
  0x4c   : > { %s2006_s4 = scalar_lea.vmem [#allocation2], %s1411_s21 }
  0x4d   : > { %1821 = dma.done.wait (%p1936_p4), %s221_s23, 2048  }
  0x4e   : > { %1823 = vsyncadd (%p1936_p4), %s221_s23, 4294965248  ;;  %s229_s0 = sand.u32 1, %s1928_s18   ;;  %s1412_s2 = sshll.u32 %s220_s5, 5 }
  0x4f   : > { %s230_s22 = scalar_lea.sflag [#allocation6], %s229_s0  ;;  %s2013_s29 = scalar_lea.vmem [#allocation5], %s1412_s2 }
  0x50   : > { %1825 = dma.done.wait (%p1936_p4), %s230_s22, 512  }
  0x51   : > { %1827 = vsyncadd (%p1936_p4), %s230_s22, 4294966784 }
  0x52   : > { %1829 = dma.done.wait (%p57_p1), [#allocation6], 4096  }
  0x53   : > { %1831 = vsyncadd (%p57_p1), [#allocation6], 4294963200  ;;  %p1414_p5 = scmp.ne.s32.totalorder %s1850_s15, 0 }
  0x55   : > { %269 = sbr.rel (%p1414_p5) target bundleno = 92 (0x5c), region = 48 }
  0x5a   : > { %v1867_v0 = vmov 0.0  }
  0x5b   : > { %270 = vst [vmem:[#allocation8] sm:$0xf] %v1867_v0 }
  0x5c PF: > { %v2025_v1 = vld [vmem:[%s2006_s4] sm:$0xff]  ;;  %v271_v2 = vlaneseq  ;;  %s1868_s19 = smov 127   ;;  %s1869_s20 = smov 1   ;;  %v2032_v3 = vld [vmem:[%s2006_s4 + $0x8] sm:$0xff]  ;;  %v2041_v5 = vld [vmem:[%s2006_s4 + $0x10] sm:$0xff]  ;;  %v1871_v26 = vmov 0  }
  0x5d   : > { %389 = vrot.lane.b32.xlu1 %v2025_v1, %s1868_s19  ;;  %357 = vrot.lane.b32.xlu0 %v2025_v1, %s1869_s20  ;;  %v2048_v6 = vld [vmem:[%s2006_s4 + $0x18] sm:$0xff]  ;;  %v2055_v7 = vld [vmem:[%s2006_s4 + $0x20] sm:$0xff]  ;;  %s1870_s15 = smov 2   ;;  %s1872_s30 = smov 126  }
  0x5e   : > { %v2034_v4 = vand.u32 127, %v271_v2  ;;  %v2062_v8 = vld [vmem:[%s2006_s4 + $0x40] sm:$0xff]  ;;  %v2069_v9 = vld [vmem:[%s2006_s4 + $0x28] sm:$0xff]  ;;  %v2083_v11 = vld [vmem:[%s2006_s4 + $0x30] sm:$0xff]  ;;  %v423_v19 = vshrl.u32 %v271_v2, 7  ;;  %s1873_s6 = smov 4  }
  0x5f   : > { %v2076_v10 = vld [vmem:[%s2006_s4 + $0x48] sm:$0xff]  ;;  %v2090_v12 = vld [vmem:[%s2006_s4 + $0x50] sm:$0xff]  ;;  %v2097_v13 = vld [vmem:[%s2006_s4 + $0x38] sm:$0xff]  ;;  %s1874_s7 = smov 8   ;;  %s1875_s9 = smov 124  }
  0x60   : > { %v2104_v14 = vld [vmem:[%s2006_s4 + $0x58] sm:$0xff]  ;;  %v2111_v15 = vld [vmem:[%s2006_s4 + $0x60] sm:$0xff]  ;;  %v2118_v16 = vld [vmem:[%s2006_s4 + $0x68] sm:$0xff]  ;;  %v275_v22 = vxor.u32 1, %v2034_v4  ;;  %v2143_v23 = vsub.s32 0, %v423_v19  ;;  %s1876_s10 = smov 120  }
  0x61   : > { %359 = vrot.lane.b32.xlu1 %v2032_v3, %s1869_s20  ;;  %273 = vrot.lane.b32.xlu0 %v2034_v4, %s1869_s20  ;;  %v2125_v17 = vld [vmem:[%s2006_s4 + $0x70] sm:$0xff]  ;;  %v2132_v18 = vld [vmem:[%s2006_s4 + $0x78] sm:$0xff]  ;;  %s1878_s12 = smov [#allocation8]   ;;  %p1511_p1 = scmp.eq.s32.totalorder %s1928_s18, 4 }
  0x62   : > { %s1303_s26 = sshll.u32 %s1878_s12, 4  ;;  %s1304_s26 = int_to_ptr.vmem [resolvable:$true] %s1303_s26 }
  0x63   : > { %s1772_s25 = scalar_lea.vmem %s1304_s26, 64  ;;  %p1779_p8 = scmp.lt.s32.totalorder %s1304_s26, %s1304_s26 }
  0x64   : > { %p1773_p4 = scmp.ne.s32.totalorder %s1304_s26, %s1772_s25  ;;  %p1780_p9 = scmp.lt.s32.totalorder %s1772_s25, %s1772_s25 }
  0x65   : > { %361 = vrot.lane.b32.xlu1 %v2041_v5, %s1869_s20  ;;  %391 = vrot.lane.b32.xlu0 %v2032_v3, %s1868_s19 }
  0x66   : > { %p1774_p7 = pnand %p1773_p4, %p1511_p1  ;;  %p1781_p10 = por %p1780_p9, %p1779_p8 }
  0x68   : > { %p1775_p12 = pneg %p1774_p7 }
  0x69   : > { %363 = vrot.lane.b32.xlu1 %v2048_v6, %s1869_s20  ;;  %393 = vrot.lane.b32.xlu0 %v2041_v5, %s1868_s19 }
  0x6a   : > { %p1782_p11 = pnand %p1781_p10, %p1775_p12 }
  0x6d   : > { %365 = vrot.lane.b32.xlu1 %v2055_v7, %s1869_s20  ;;  %395 = vrot.lane.b32.xlu0 %v2048_v6, %s1868_s19 }
  0x71   : > { %397 = vrot.lane.b32.xlu1 %v2055_v7, %s1868_s19  ;;  %373 = vrot.lane.b32.xlu0 %v2062_v8, %s1869_s20 }
  0x75   : > { %367 = vrot.lane.b32.xlu1 %v2069_v9, %s1869_s20  ;;  %405 = vrot.lane.b32.xlu0 %v2062_v8, %s1868_s19 }
  0x79   : > { %399 = vrot.lane.b32.xlu1 %v2069_v9, %s1868_s19  ;;  %375 = vrot.lane.b32.xlu0 %v2076_v10, %s1869_s20 }
  0x7d   : > { %369 = vrot.lane.b32.xlu1 %v2083_v11, %s1869_s20  ;;  %407 = vrot.lane.b32.xlu0 %v2076_v10, %s1868_s19 }
  0x81   : > { %401 = vrot.lane.b32.xlu1 %v2083_v11, %s1868_s19  ;;  %377 = vrot.lane.b32.xlu0 %v2090_v12, %s1869_s20 }
  0x85   : > { %371 = vrot.lane.b32.xlu1 %v2097_v13, %s1869_s20  ;;  %409 = vrot.lane.b32.xlu0 %v2090_v12, %s1868_s19 }
  0x89   : > { %403 = vrot.lane.b32.xlu1 %v2097_v13, %s1868_s19  ;;  %379 = vrot.lane.b32.xlu0 %v2104_v14, %s1869_s20 }
  0x8d   : > { %411 = vrot.lane.b32.xlu0 %v2104_v14, %s1868_s19  ;;  %381 = vrot.lane.b32.xlu1 %v2111_v15, %s1869_s20 }
  0x91   : > { %413 = vrot.lane.b32.xlu0 %v2111_v15, %s1868_s19  ;;  %383 = vrot.lane.b32.xlu1 %v2118_v16, %s1869_s20 }
  0x95   : > { %415 = vrot.lane.b32.xlu0 %v2118_v16, %s1868_s19  ;;  %385 = vrot.lane.b32.xlu1 %v2125_v17, %s1869_s20 }
  0x99   : > { %417 = vrot.lane.b32.xlu0 %v2125_v17, %s1868_s19  ;;  %387 = vrot.lane.b32.xlu1 %v2132_v18, %s1869_s20 }
  0x9d   : > { %419 = vrot.lane.b32.xlu0 %v2132_v18, %s1868_s19  ;;  %277 = vrot.lane.b32.xlu1 %v2034_v4, %s1870_s15 }
  0xcf   : > { %v390_v20 = vpop.permute.xlu1 %389  ;;  %v358_v21 = vpop.permute.xlu0 %357 }
  0xd3   : > { %v360_v24 = vpop.permute.xlu1 %359  ;;  %v274_v25 = vpop.permute.xlu0 %273 }
  0xd4   : > { %vm276_vm0 = vcmp.eq.s32.totalorder %v274_v25, %v275_v22 }
  0xd5   : > { %v421_v27 = vsel %vm276_vm0, 1, %v1871_v26 }
  0xd6   : > { %v425_v28 = vrot.slane %v421_v27, %v2143_v23 }
  0xd7   : > { %v362_v29 = vpop.permute.xlu1 %361  ;;  %v392_v30 = vpop.permute.xlu0 %391 }
  0xd8   : > { %vm2147_vm1 = vcmp.eq.s32.totalorder %v425_v28, 1 }
  0xd9   : > { %v427_v32 = vsel %vm2147_vm1, %v358_v21, %v390_v20  ;;  %v428_v34 = vsel %vm2147_vm1, %v360_v24, %v392_v30 }
  0xda   : > { %v2154_v33 = vmax.f32 %v2025_v1, %v427_v32  ;;  %v2163_v37 = vmax.f32 %v2032_v3, %v428_v34 }
  0xdb   : > { %v364_v35 = vpop.permute.xlu1 %363  ;;  %v394_v36 = vpop.permute.xlu0 %393 }
  0xdc   : > { %491 = vrot.lane.b32.xlu1 %v2154_v33, %s1872_s30  ;;  %459 = vrot.lane.b32.xlu0 %v2154_v33, %s1870_s15  ;;  %v429_v38 = vsel %vm2147_vm1, %v362_v29, %v394_v36 }
  0xdd   : > { %v2172_v41 = vmax.f32 %v2041_v5, %v429_v38 }
  0xdf   : > { %v366_v39 = vpop.permute.xlu1 %365  ;;  %v396_v40 = vpop.permute.xlu0 %395 }
  0xe0   : > { %493 = vrot.lane.b32.xlu1 %v2163_v37, %s1872_s30  ;;  %461 = vrot.lane.b32.xlu0 %v2163_v37, %s1870_s15  ;;  %v430_v42 = vsel %vm2147_vm1, %v364_v35, %v396_v40 }
  0xe1   : > { %v2181_v45 = vmax.f32 %v2048_v6, %v430_v42 }
  0xe3   : > { %v398_v43 = vpop.permute.xlu1 %397  ;;  %v374_v44 = vpop.permute.xlu0 %373 }
  0xe4   : > { %495 = vrot.lane.b32.xlu1 %v2172_v41, %s1872_s30  ;;  %463 = vrot.lane.b32.xlu0 %v2172_v41, %s1870_s15  ;;  %v431_v46 = vsel %vm2147_vm1, %v366_v39, %v398_v43  ;;  %v315_v43 = vld [vmem:[#allocation7 + $0xd0] sm:$0xff] }
  0xe5   : > { %v2195_v51 = vmax.f32 %v2055_v7, %v431_v46 }
  0xe7   : > { %v368_v47 = vpop.permute.xlu1 %367  ;;  %v406_v48 = vpop.permute.xlu0 %405 }
  0xe8   : > { %v435_v49 = vsel %vm2147_vm1, %v374_v44, %v406_v48  ;;  %497 = vrot.lane.b32.xlu1 %v2181_v45, %s1872_s30  ;;  %465 = vrot.lane.b32.xlu0 %v2181_v45, %s1870_s15 }
  0xe9   : > { %v2192_v50 = vmax.f32 %v2062_v8, %v435_v49 }
  0xeb   : > { %v400_v52 = vpop.permute.xlu1 %399  ;;  %v376_v53 = vpop.permute.xlu0 %375 }
  0xec   : > { %475 = vrot.lane.b32.xlu1 %v2192_v50, %s1870_s15  ;;  %467 = vrot.lane.b32.xlu0 %v2195_v51, %s1870_s15  ;;  %v432_v54 = vsel %vm2147_vm1, %v368_v47, %v400_v52 }
  0xed   : > { %v2213_v59 = vmax.f32 %v2069_v9, %v432_v54 }
  0xef   : > { %v370_v55 = vpop.permute.xlu1 %369  ;;  %v408_v56 = vpop.permute.xlu0 %407 }
  0xf0   : > { %v436_v57 = vsel %vm2147_vm1, %v376_v53, %v408_v56  ;;  %507 = vrot.lane.b32.xlu1 %v2192_v50, %s1872_s30  ;;  %499 = vrot.lane.b32.xlu0 %v2195_v51, %s1872_s30 }
  0xf1   : > { %v2210_v58 = vmax.f32 %v2076_v10, %v436_v57 }
  0xf3   : > { %v402_v60 = vpop.permute.xlu1 %401  ;;  %v378_v61 = vpop.permute.xlu0 %377 }
  0xf4   : > { %477 = vrot.lane.b32.xlu1 %v2210_v58, %s1870_s15  ;;  %469 = vrot.lane.b32.xlu0 %v2213_v59, %s1870_s15  ;;  %v433_v62 = vsel %vm2147_vm1, %v370_v55, %v402_v60 }
  0xf5   : > { %v2231_v10 = vmax.f32 %v2083_v11, %v433_v62 }
  0xf7   : > { %v372_v63 = vpop.permute.xlu1 %371  ;;  %v410_v0 = vpop.permute.xlu0 %409 }
  0xf8   : > { %v437_v2 = vsel %vm2147_vm1, %v378_v61, %v410_v0  ;;  %509 = vrot.lane.b32.xlu1 %v2210_v58, %s1872_s30  ;;  %501 = vrot.lane.b32.xlu0 %v2213_v59, %s1872_s30 }
  0xf9   : > { %v2228_v9 = vmax.f32 %v2090_v12, %v437_v2 }
  0xfb   : > { %v404_v19 = vpop.permute.xlu1 %403  ;;  %v380_v20 = vpop.permute.xlu0 %379 }
  0xfc   : > { %479 = vrot.lane.b32.xlu1 %v2228_v9, %s1870_s15  ;;  %471 = vrot.lane.b32.xlu0 %v2231_v10, %s1870_s15  ;;  %v434_v21 = vsel %vm2147_vm1, %v372_v63, %v404_v19 }
  0xfd   : > { %v2249_v25 = vmax.f32 %v2097_v13, %v434_v21 }
  0xff   : > { %v412_v22 = vpop.permute.xlu0 %411  ;;  %v382_v24 = vpop.permute.xlu1 %381 }
 0x100   : > { %v438_v12 = vsel %vm2147_vm1, %v380_v20, %v412_v22  ;;  %511 = vrot.lane.b32.xlu1 %v2228_v9, %s1872_s30  ;;  %503 = vrot.lane.b32.xlu0 %v2231_v10, %s1872_s30 }
 0x101   : > { %v2246_v11 = vmax.f32 %v2104_v14, %v438_v12 }
 0x103   : > { %v414_v27 = vpop.permute.xlu0 %413  ;;  %v384_v28 = vpop.permute.xlu1 %383 }
 0x104   : > { %481 = vrot.lane.b32.xlu1 %v2246_v11, %s1870_s15  ;;  %473 = vrot.lane.b32.xlu0 %v2249_v25, %s1870_s15  ;;  %v439_v29 = vsel %vm2147_vm1, %v382_v24, %v414_v27 }
 0x105   : > { %v2262_v13 = vmax.f32 %v2111_v15, %v439_v29 }
 0x107   : > { %v416_v30 = vpop.permute.xlu0 %415  ;;  %v386_v14 = vpop.permute.xlu1 %385 }
 0x108   : > { %513 = vrot.lane.b32.xlu1 %v2246_v11, %s1872_s30  ;;  %505 = vrot.lane.b32.xlu0 %v2249_v25, %s1872_s30  ;;  %v440_v32 = vsel %vm2147_vm1, %v384_v28, %v416_v30 }
 0x109   : > { %v2271_v35 = vmax.f32 %v2118_v16, %v440_v32 }
 0x10b   : > { %v418_v34 = vpop.permute.xlu0 %417  ;;  %v388_v38 = vpop.permute.xlu1 %387 }
 0x10c   : > { %515 = vrot.lane.b32.xlu1 %v2262_v13, %s1872_s30  ;;  %483 = vrot.lane.b32.xlu0 %v2262_v13, %s1870_s15  ;;  %v441_v36 = vsel %vm2147_vm1, %v386_v14, %v418_v34 }
 0x10d   : > { %v2280_v39 = vmax.f32 %v2125_v17, %v441_v36  ;;  %v279_v17 = vxor.u32 2, %v2034_v4 }
 0x10f   : > { %v420_v15 = vpop.permute.xlu0 %419  ;;  %v278_v31 = vpop.permute.xlu1 %277 }
 0x110   : > { %517 = vrot.lane.b32.xlu1 %v2271_v35, %s1872_s30  ;;  %485 = vrot.lane.b32.xlu0 %v2271_v35, %s1870_s15  ;;  %v442_v40 = vsel %vm2147_vm1, %v388_v38, %v420_v15  ;;  %vm280_vm2 = vcmp.eq.s32.totalorder %v278_v31, %v279_v17 }
 0x111   : > { %v2289_v16 = vmax.f32 %v2132_v18, %v442_v40  ;;  %v523_v18 = vsel %vm280_vm2, 1, %v1871_v26 }
 0x112   : > { %v527_v42 = vrot.slane %v523_v18, %v2143_v23 }
 0x114   : > { %519 = vrot.lane.b32.xlu1 %v2280_v39, %s1872_s30  ;;  %487 = vrot.lane.b32.xlu0 %v2280_v39, %s1870_s15  ;;  %vm2302_vm3 = vcmp.eq.s32.totalorder %v527_v42, 1 }
 0x118   : > { %521 = vrot.lane.b32.xlu1 %v2289_v16, %s1872_s30  ;;  %489 = vrot.lane.b32.xlu0 %v2289_v16, %s1870_s15 }
 0x11c   : > { %281 = vrot.lane.b32.xlu0 %v2034_v4, %s1873_s6  ;;  %285 = vrot.lane.b32.xlu1 %v2034_v4, %s1874_s7 }
 0x14e   : > { %v492_v44 = vpop.permute.xlu1 %491  ;;  %v460_v46 = vpop.permute.xlu0 %459 }
 0x14f   : > { %v529_v47 = vsel %vm2302_vm3, %v460_v46, %v492_v44 }
 0x150   : > { %v2309_v48 = vmax.f32 %v2154_v33, %v529_v47 }
 0x152   : > { %v494_v49 = vpop.permute.xlu1 %493  ;;  %593 = vrot.lane.b32.xlu0 %v2309_v48, %s1875_s9  ;;  %561 = vrot.lane.b32.xlu1 %v2309_v48, %s1873_s6  ;;  %v462_v52 = vpop.permute.xlu0 %461 }
 0x153   : > { %v530_v53 = vsel %vm2302_vm3, %v462_v52, %v494_v49 }
 0x154   : > { %v2318_v54 = vmax.f32 %v2163_v37, %v530_v53 }
 0x156   : > { %v496_v55 = vpop.permute.xlu1 %495  ;;  %595 = vrot.lane.b32.xlu0 %v2318_v54, %s1875_s9  ;;  %563 = vrot.lane.b32.xlu1 %v2318_v54, %s1873_s6  ;;  %v464_v33 = vpop.permute.xlu0 %463 }
 0x157   : > { %v531_v56 = vsel %vm2302_vm3, %v464_v33, %v496_v55 }
 0x158   : > { %v2327_v57 = vmax.f32 %v2172_v41, %v531_v56 }
 0x15a   : > { %v498_v60 = vpop.permute.xlu1 %497  ;;  %597 = vrot.lane.b32.xlu0 %v2327_v57, %s1875_s9  ;;  %565 = vrot.lane.b32.xlu1 %v2327_v57, %s1873_s6  ;;  %v466_v37 = vpop.permute.xlu0 %465 }
 0x15b   : > { %v532_v61 = vsel %vm2302_vm3, %v466_v37, %v498_v60 }
 0x15c   : > { %v2336_v62 = vmax.f32 %v2181_v45, %v532_v61  ;;  %v320_v61 = vld [vmem:[#allocation7 + $0xf8] sm:$0xff] }
 0x15d   : > { %813 = vmatprep.subr.mxu0 %v320_v61  ;;  %1453 = vmatprep.subr.mxu1 %v320_v61  ;;  %v294_v61 = vld [vmem:[#allocation7 + $0x28] sm:$0xff] }
 0x15e   : > { %v476_v63 = vpop.permute.xlu1 %475  ;;  %599 = vrot.lane.b32.xlu0 %v2336_v62, %s1875_s9  ;;  %567 = vrot.lane.b32.xlu1 %v2336_v62, %s1873_s6  ;;  %v468_v41 = vpop.permute.xlu0 %467 }
 0x162   : > { %v508_v0 = vpop.permute.xlu1 %507  ;;  %v500_v2 = vpop.permute.xlu0 %499 }
 0x163   : > { %v537_v19 = vsel %vm2302_vm3, %v476_v63, %v508_v0  ;;  %v533_v20 = vsel %vm2302_vm3, %v468_v41, %v500_v2  ;;  %v319_v63 = vld [vmem:[#allocation7 + $0xf0] sm:$0xff]  ;;  %v318_v41 = vld [vmem:[#allocation7 + $0xe8] sm:$0xff]  ;;  %v317_v0 = vld [vmem:[#allocation7 + $0xe0] sm:$0xff] }
 0x164   : > { %v2347_v21 = vmax.f32 %v2192_v50, %v537_v19  ;;  %v2350_v45 = vmax.f32 %v2195_v51, %v533_v20  ;;  %814 = vmatpush1.msra.mxu0 %v319_v63  ;;  %1469 = vmatpush1.msra.mxu1 %v319_v63  ;;  %v316_v2 = vld [vmem:[#allocation7 + $0xd8] sm:$0xff]  ;;  %v314_v19 = vld [vmem:[#allocation7 + $0xc8] sm:$0xff]  ;;  %v313_v20 = vld [vmem:[#allocation7 + $0xc0] sm:$0xff] }
 0x165   : > { %815 = vmatprep.subr.mxu0 %v318_v41  ;;  %1454 = vmatprep.subr.mxu1 %v318_v41  ;;  %v292_v41 = vld [vmem:[#allocation7 + $0x18] sm:$0xff] }
 0x166   : > { %v478_v22 = vpop.permute.xlu1 %477  ;;  %577 = vrot.lane.b32.xlu0 %v2347_v21, %s1873_s6  ;;  %569 = vrot.lane.b32.xlu1 %v2350_v45, %s1873_s6  ;;  %v470_v24 = vpop.permute.xlu0 %469 }
 0x167   : > { %816 = vmatpush1.msra.mxu0 %v317_v0  ;;  %1470 = vmatpush1.msra.mxu1 %v317_v0 }
 0x168   : > { %817 = vmatprep.subr.mxu0 %v316_v2  ;;  %1455 = vmatprep.subr.mxu1 %v316_v2 }
 0x169   : > { %818 = vmatpush1.msra.mxu0 %v315_v43  ;;  %1471 = vmatpush1.msra.mxu1 %v315_v43  ;;  %v291_v43 = vld [vmem:[#allocation7 + $0x10] sm:$0xff] }
 0x16a   : > { %v510_v12 = vpop.permute.xlu1 %509  ;;  %609 = vrot.lane.b32.xlu0 %v2347_v21, %s1875_s9  ;;  %601 = vrot.lane.b32.xlu1 %v2350_v45, %s1875_s9  ;;  %v502_v50 = vpop.permute.xlu0 %501 }
 0x16b   : > { %v538_v51 = vsel %vm2302_vm3, %v478_v22, %v510_v12  ;;  %v534_v27 = vsel %vm2302_vm3, %v470_v24, %v502_v50  ;;  %v312_v22 = vld [vmem:[#allocation7 + $0xb8] sm:$0xff]  ;;  %819 = vmatprep.subr.mxu0 %v314_v19  ;;  %1456 = vmatprep.subr.mxu1 %v314_v19  ;;  %v310_v24 = vld [vmem:[#allocation7 + $0xa8] sm:$0xff]  ;;  %v283_v12 = vxor.u32 4, %v2034_v4 }
 0x16c   : > { %v2365_v28 = vmax.f32 %v2210_v58, %v538_v51  ;;  %v2368_v29 = vmax.f32 %v2213_v59, %v534_v27  ;;  %820 = vmatpush1.msra.mxu0 %v313_v20  ;;  %1472 = vmatpush1.msra.mxu1 %v313_v20  ;;  %v309_v51 = vld [vmem:[#allocation7 + $0xa0] sm:$0xff]  ;;  %v290_v20 = vld [vmem:[#allocation7 + $0x8] sm:$0xff] }
 0x16d   : > { %821 = vmatprep.subr.mxu0 %v312_v22  ;;  %1457 = vmatprep.subr.mxu1 %v312_v22  ;;  %v289_v22 = vld [vmem:[#allocation7] sm:$0xff] }
 0x16e   : > { %v480_v30 = vpop.permute.xlu1 %479  ;;  %579 = vrot.lane.b32.xlu0 %v2365_v28, %s1873_s6  ;;  %571 = vrot.lane.b32.xlu1 %v2368_v29, %s1873_s6  ;;  %v472_v14 = vpop.permute.xlu0 %471 }
 0x172   : > { %v512_v32 = vpop.permute.xlu1 %511  ;;  %611 = vrot.lane.b32.xlu0 %v2365_v28, %s1875_s9  ;;  %603 = vrot.lane.b32.xlu1 %v2368_v29, %s1875_s9  ;;  %v504_v58 = vpop.permute.xlu0 %503 }
 0x173   : > { %v539_v59 = vsel %vm2302_vm3, %v480_v30, %v512_v32  ;;  %v535_v34 = vsel %vm2302_vm3, %v472_v14, %v504_v58  ;;  %v308_v30 = vld [vmem:[#allocation7 + $0x98] sm:$0xff]  ;;  %v307_v14 = vld [vmem:[#allocation7 + $0x90] sm:$0xff]  ;;  %v306_v32 = vld [vmem:[#allocation7 + $0x88] sm:$0xff] }
 0x174   : > { %v2383_v36 = vmax.f32 %v2228_v9, %v539_v59  ;;  %v2386_v38 = vmax.f32 %v2231_v10, %v535_v34  ;;  %v305_v34 = vld [vmem:[#allocation7 + $0x80] sm:$0xff] }
 0x176   : > { %v482_v15 = vpop.permute.xlu1 %481  ;;  %581 = vrot.lane.b32.xlu0 %v2383_v36, %s1873_s6  ;;  %573 = vrot.lane.b32.xlu1 %v2386_v38, %s1873_s6  ;;  %v474_v40 = vpop.permute.xlu0 %473 }
 0x17a   : > { %v514_v17 = vpop.permute.xlu1 %513  ;;  %613 = vrot.lane.b32.xlu0 %v2383_v36, %s1875_s9  ;;  %605 = vrot.lane.b32.xlu1 %v2386_v38, %s1875_s9  ;;  %v506_v9 = vpop.permute.xlu0 %505 }
 0x17b   : > { %v540_v10 = vsel %vm2302_vm3, %v482_v15, %v514_v17  ;;  %v536_v31 = vsel %vm2302_vm3, %v474_v40, %v506_v9  ;;  %v304_v15 = vld [vmem:[#allocation7 + $0x78] sm:$0xff]  ;;  %v303_v40 = vld [vmem:[#allocation7 + $0x70] sm:$0xff]  ;;  %v302_v17 = vld [vmem:[#allocation7 + $0x68] sm:$0xff] }
 0x17c   : > { %v2401_v18 = vmax.f32 %v2246_v11, %v540_v10  ;;  %v2404_v42 = vmax.f32 %v2249_v25, %v536_v31  ;;  %v301_v10 = vld [vmem:[#allocation7 + $0x60] sm:$0xff]  ;;  %v300_v31 = vld [vmem:[#allocation7 + $0x58] sm:$0xff] }
 0x17e   : > { %v516_v44 = vpop.permute.xlu1 %515  ;;  %583 = vrot.lane.b32.xlu0 %v2401_v18, %s1873_s6  ;;  %575 = vrot.lane.b32.xlu1 %v2404_v42, %s1873_s6  ;;  %v484_v46 = vpop.permute.xlu0 %483 }
 0x17f   : > { %v541_v47 = vsel %vm2302_vm3, %v484_v46, %v516_v44 }
 0x180   : > { %v2417_v25 = vmax.f32 %v2262_v13, %v541_v47  ;;  %v299_v47 = vld [vmem:[#allocation7 + $0x50] sm:$0xff] }
 0x182   : > { %v518_v49 = vpop.permute.xlu1 %517  ;;  %615 = vrot.lane.b32.xlu0 %v2401_v18, %s1875_s9  ;;  %607 = vrot.lane.b32.xlu1 %v2404_v42, %s1875_s9  ;;  %v486_v11 = vpop.permute.xlu0 %485 }
 0x183   : > { %v542_v52 = vsel %vm2302_vm3, %v486_v11, %v518_v49  ;;  %v298_v11 = vld [vmem:[#allocation7 + $0x48] sm:$0xff] }
 0x184   : > { %v2426_v33 = vmax.f32 %v2271_v35, %v542_v52 }
 0x186   : > { %v520_v53 = vpop.permute.xlu1 %519  ;;  %617 = vrot.lane.b32.xlu0 %v2417_v25, %s1875_s9  ;;  %585 = vrot.lane.b32.xlu1 %v2417_v25, %s1873_s6  ;;  %v488_v55 = vpop.permute.xlu0 %487 }
 0x187   : > { %v543_v56 = vsel %vm2302_vm3, %v488_v55, %v520_v53  ;;  %v297_v53 = vld [vmem:[#allocation7 + $0x40] sm:$0xff]  ;;  %v296_v55 = vld [vmem:[#allocation7 + $0x38] sm:$0xff] }
 0x188   : > { %v2435_v37 = vmax.f32 %v2280_v39, %v543_v56 }
 0x18a   : > { %v522_v60 = vpop.permute.xlu1 %521  ;;  %619 = vrot.lane.b32.xlu0 %v2426_v33, %s1875_s9  ;;  %587 = vrot.lane.b32.xlu1 %v2426_v33, %s1873_s6  ;;  %v490_v13 = vpop.permute.xlu0 %489 }
 0x18b   : > { %v544_v35 = vsel %vm2302_vm3, %v490_v13, %v522_v60  ;;  %v295_v13 = vld [vmem:[#allocation7 + $0x30] sm:$0xff] }
 0x18c   : > { %v2444_v39 = vmax.f32 %v2289_v16, %v544_v35  ;;  %v311_v16 = vld [vmem:[#allocation7 + $0xb0] sm:$0xff]  ;;  %v293_v35 = vld [vmem:[#allocation7 + $0x20] sm:$0xff] }
 0x18d   : > { %822 = vmatpush1.msra.mxu0 %v311_v16  ;;  %1473 = vmatpush1.msra.mxu1 %v311_v16  ;;  %v1877_v16 = vmov 0.0  }
 0x18e   : > { %621 = vrot.lane.b32.xlu0 %v2435_v37, %s1875_s9  ;;  %589 = vrot.lane.b32.xlu1 %v2435_v37, %s1873_s6  ;;  %v282_v50 = vpop.permute.xlu0 %281  ;;  %v2453_v59 = vpop.permute.xlu1 %285 }
 0x18f   : > { %823 = vmatprep.subr.mxu0 %v310_v24  ;;  %1458 = vmatprep.subr.mxu1 %v310_v24  ;;  %vm284_vm4 = vcmp.eq.s32.totalorder %v282_v50, %v283_v12 }
 0x190   : > { %v625_v27 = vsel %vm284_vm4, 1, %v1871_v26  ;;  %824 = vmatpush1.msra.mxu0 %v309_v51  ;;  %1474 = vmatpush1.msra.mxu1 %v309_v51 }
 0x191   : > { %825 = vmatprep.subr.mxu0 %v308_v30  ;;  %1459 = vmatprep.subr.mxu1 %v308_v30  ;;  %v629_v58 = vrot.slane %v625_v27, %v2143_v23 }
 0x192   : > { %623 = vrot.lane.b32.xlu0 %v2444_v39, %s1875_s9  ;;  %591 = vrot.lane.b32.xlu1 %v2444_v39, %s1873_s6 }
 0x193   : > { %826 = vmatpush1.msra.mxu0 %v307_v14  ;;  %1475 = vmatpush1.msra.mxu1 %v307_v14  ;;  %vm2455_vm5 = vcmp.eq.s32.totalorder %v629_v58, 1 }
 0x194   : > { %827 = vmatprep.subr.mxu0 %v306_v32  ;;  %1460 = vmatprep.subr.mxu1 %v306_v32 }
 0x195   : > { %828 = vmatpush1.msra.mxu0 %v305_v34  ;;  %1476 = vmatpush1.msra.mxu1 %v305_v34 }
 0x196   : > { %829 = vmatprep.subr.mxu0 %v304_v15  ;;  %1461 = vmatprep.subr.mxu1 %v304_v15 }
 0x197   : > { %830 = vmatpush1.msra.mxu0 %v303_v40  ;;  %1477 = vmatpush1.msra.mxu1 %v303_v40 }
 0x198   : > { %831 = vmatprep.subr.mxu0 %v302_v17  ;;  %1462 = vmatprep.subr.mxu1 %v302_v17 }
 0x199   : > { %832 = vmatpush1.msra.mxu0 %v301_v10  ;;  %1478 = vmatpush1.msra.mxu1 %v301_v10 }
 0x19a   : > { %833 = vmatprep.subr.mxu0 %v300_v31  ;;  %1463 = vmatprep.subr.mxu1 %v300_v31 }
 0x19b   : > { %834 = vmatpush1.msra.mxu0 %v299_v47  ;;  %1479 = vmatpush1.msra.mxu1 %v299_v47 }
 0x19c   : > { %835 = vmatprep.subr.mxu0 %v298_v11  ;;  %1464 = vmatprep.subr.mxu1 %v298_v11 }
 0x19d   : > { %836 = vmatpush1.msra.mxu0 %v297_v53  ;;  %1480 = vmatpush1.msra.mxu1 %v297_v53 }
 0x19e   : > { %837 = vmatprep.subr.mxu0 %v296_v55  ;;  %1465 = vmatprep.subr.mxu1 %v296_v55 }
 0x19f   : > { %838 = vmatpush1.msra.mxu0 %v295_v13  ;;  %1481 = vmatpush1.msra.mxu1 %v295_v13 }
 0x1a0   : > { %839 = vmatprep.subr.mxu0 %v294_v61  ;;  %1466 = vmatprep.subr.mxu1 %v294_v61 }
 0x1a1   : > { %840 = vmatpush1.msra.mxu0 %v293_v35  ;;  %1482 = vmatpush1.msra.mxu1 %v293_v35 }
 0x1a2   : > { %841 = vmatprep.subr.mxu0 %v292_v41  ;;  %1467 = vmatprep.subr.mxu1 %v292_v41 }
 0x1a3   : > { %842 = vmatpush1.msra.mxu0 %v291_v43  ;;  %877 = vmatprep.mubr.f32.mxu0 %v1877_v16 }
 0x1a4   : > { %843 = vmatprep.subr.mxu0 %v290_v20  ;;  %1483 = vmatpush1.msra.mxu1 %v291_v43 }
 0x1a5   : > { %844 = vmatpush1.msra.mxu0 %v289_v22  ;;  %1468 = vmatprep.subr.mxu1 %v290_v20 }
 0x1a6   : > { %1484 = vmatpush1.msra.mxu1 %v289_v22  ;;  %925 = vmatprep.mubr.f32.mxu1 %v1877_v16 }
 0x1c4   : > { %v562_v44 = vpop.permute.xlu1 %561  ;;  %v594_v46 = vpop.permute.xlu0 %593 }
 0x1c5   : > { %v631_v49 = vsel %vm2455_vm5, %v562_v44, %v594_v46 }
 0x1c6   : > { %v2462_v52 = vmax.f32 %v2309_v48, %v631_v49 }
 0x1c8   : > { %v564_v56 = vpop.permute.xlu1 %563  ;;  %695 = vrot.lane.b32.xlu1 %v2462_v52, %s1876_s10  ;;  %663 = vrot.lane.b32.xlu0 %v2462_v52, %s1874_s7  ;;  %v596_v60 = vpop.permute.xlu0 %595 }
 0x1c9   : > { %v632_v48 = vsel %vm2455_vm5, %v564_v56, %v596_v60 }
 0x1ca   : > { %v2471_v63 = vmax.f32 %v2318_v54, %v632_v48 }
 0x1cc   : > { %v566_v0 = vpop.permute.xlu1 %565  ;;  %697 = vrot.lane.b32.xlu1 %v2471_v63, %s1876_s10  ;;  %665 = vrot.lane.b32.xlu0 %v2471_v63, %s1874_s7  ;;  %v598_v2 = vpop.permute.xlu0 %597 }
 0x1cd   : > { %v633_v19 = vsel %vm2455_vm5, %v566_v0, %v598_v2 }
 0x1ce   : > { %v2480_v54 = vmax.f32 %v2327_v57, %v633_v19 }
 0x1d0   : > { %v568_v24 = vpop.permute.xlu1 %567  ;;  %699 = vrot.lane.b32.xlu1 %v2480_v54, %s1876_s10  ;;  %667 = vrot.lane.b32.xlu0 %v2480_v54, %s1874_s7  ;;  %v600_v12 = vpop.permute.xlu0 %599 }
 0x1d1   : > { %v634_v57 = vsel %vm2455_vm5, %v568_v24, %v600_v12 }
 0x1d2   : > { %v2490_v50 = vmax.f32 %v2336_v62, %v634_v57 }
 0x1d4   : > { %701 = vrot.lane.b32.xlu1 %v2490_v50, %s1876_s10  ;;  %669 = vrot.lane.b32.xlu0 %v2490_v50, %s1874_s7 }
 0x1d8   : > { %v570_v51 = vpop.permute.xlu1 %569  ;;  %v578_v27 = vpop.permute.xlu0 %577 }
 0x1dc   : > { %v602_v30 = vpop.permute.xlu1 %601  ;;  %v610_v14 = vpop.permute.xlu0 %609 }
 0x1dd   : > { %v635_v32 = vsel %vm2455_vm5, %v570_v51, %v602_v30  ;;  %v639_v62 = vsel %vm2455_vm5, %v578_v27, %v610_v14 }
 0x1de   : > { %v2502_v58 = vmax.f32 %v2350_v45, %v635_v32  ;;  %v2505_v34 = vmax.f32 %v2347_v21, %v639_v62 }
 0x1e0   : > { %v572_v15 = vpop.permute.xlu1 %571  ;;  %671 = vrot.lane.b32.xlu0 %v2502_v58, %s1874_s7  ;;  %679 = vrot.lane.b32.xlu1 %v2505_v34, %s1874_s7  ;;  %v580_v40 = vpop.permute.xlu0 %579 }
 0x1e4   : > { %v604_v17 = vpop.permute.xlu1 %603  ;;  %703 = vrot.lane.b32.xlu0 %v2502_v58, %s1876_s10  ;;  %711 = vrot.lane.b32.xlu1 %v2505_v34, %s1876_s10  ;;  %v612_v45 = vpop.permute.xlu0 %611 }
 0x1e5   : > { %v636_v21 = vsel %vm2455_vm5, %v572_v15, %v604_v17  ;;  %v640_v10 = vsel %vm2455_vm5, %v580_v40, %v612_v45 }
 0x1e6   : > { %v2520_v31 = vmax.f32 %v2368_v29, %v636_v21  ;;  %v2523_v44 = vmax.f32 %v2365_v28, %v640_v10 }
 0x1e8   : > { %v574_v46 = vpop.permute.xlu1 %573  ;;  %673 = vrot.lane.b32.xlu0 %v2520_v31, %s1874_s7  ;;  %681 = vrot.lane.b32.xlu1 %v2523_v44, %s1874_s7  ;;  %v582_v47 = vpop.permute.xlu0 %581 }
 0x1ec   : > { %v606_v49 = vpop.permute.xlu1 %605  ;;  %705 = vrot.lane.b32.xlu0 %v2520_v31, %s1876_s10  ;;  %713 = vrot.lane.b32.xlu1 %v2523_v44, %s1876_s10  ;;  %v614_v29 = vpop.permute.xlu0 %613 }
 0x1ed   : > { %v637_v28 = vsel %vm2455_vm5, %v574_v46, %v606_v49  ;;  %v641_v11 = vsel %vm2455_vm5, %v582_v47, %v614_v29 }
 0x1ee   : > { %v2538_v53 = vmax.f32 %v2386_v38, %v637_v28  ;;  %v2541_v55 = vmax.f32 %v2383_v36, %v641_v11 }
 0x1f0   : > { %v576_v56 = vpop.permute.xlu1 %575  ;;  %675 = vrot.lane.b32.xlu0 %v2538_v53, %s1874_s7  ;;  %683 = vrot.lane.b32.xlu1 %v2541_v55, %s1874_s7  ;;  %v584_v60 = vpop.permute.xlu0 %583 }
 0x1f4   : > { %v608_v13 = vpop.permute.xlu1 %607  ;;  %707 = vrot.lane.b32.xlu0 %v2538_v53, %s1876_s10  ;;  %715 = vrot.lane.b32.xlu1 %v2541_v55, %s1876_s10  ;;  %v616_v38 = vpop.permute.xlu0 %615 }
 0x1f5   : > { %v638_v36 = vsel %vm2455_vm5, %v576_v56, %v608_v13  ;;  %v642_v48 = vsel %vm2455_vm5, %v584_v60, %v616_v38 }
 0x1f6   : > { %v2556_v61 = vmax.f32 %v2404_v42, %v638_v36  ;;  %v2559_v35 = vmax.f32 %v2401_v18, %v642_v48 }
 0x1f8   : > { %v586_v41 = vpop.permute.xlu1 %585  ;;  %677 = vrot.lane.b32.xlu0 %v2556_v61, %s1874_s7  ;;  %685 = vrot.lane.b32.xlu1 %v2559_v35, %s1874_s7  ;;  %v618_v0 = vpop.permute.xlu0 %617 }
 0x1f9   : > { %v643_v2 = vsel %vm2455_vm5, %v586_v41, %v618_v0 }
 0x1fa   : > { %v2572_v42 = vmax.f32 %v2417_v25, %v643_v2 }
 0x1fc   : > { %v588_v43 = vpop.permute.xlu1 %587  ;;  %709 = vrot.lane.b32.xlu0 %v2556_v61, %s1876_s10  ;;  %717 = vrot.lane.b32.xlu1 %v2559_v35, %s1876_s10  ;;  %v620_v18 = vpop.permute.xlu0 %619 }
 0x1fd   : > { %v644_v19 = vsel %vm2455_vm5, %v588_v43, %v620_v18 }
 0x1fe   : > { %v2581_v24 = vmax.f32 %v2426_v33, %v644_v19 }
 0x200   : > { %v590_v20 = vpop.permute.xlu1 %589  ;;  %719 = vrot.lane.b32.xlu1 %v2572_v42, %s1876_s10  ;;  %687 = vrot.lane.b32.xlu0 %v2572_v42, %s1874_s7  ;;  %v622_v22 = vpop.permute.xlu0 %621 }
 0x201   : > { %v645_v12 = vsel %vm2455_vm5, %v590_v20, %v622_v22 }
 0x202   : > { %v2590_v51 = vmax.f32 %v2435_v37, %v645_v12  ;;  %v287_v37 = vxor.u32 8, %v2034_v4 }
 0x204   : > { %v592_v57 = vpop.permute.xlu1 %591  ;;  %721 = vrot.lane.b32.xlu1 %v2581_v24, %s1876_s10  ;;  %689 = vrot.lane.b32.xlu0 %v2581_v24, %s1874_s7  ;;  %v624_v25 = vpop.permute.xlu0 %623  ;;  %vm288_vm6 = vcmp.eq.s32.totalorder %v2453_v59, %v287_v37 }
 0x205   : > { %v646_v27 = vsel %vm2455_vm5, %v592_v57, %v624_v25  ;;  %v727_v9 = vsel %vm288_vm6, 1, %v1871_v26 }
 0x206   : > { %v2599_v33 = vmax.f32 %v2444_v39, %v646_v27  ;;  %v731_v30 = vrot.slane %v727_v9, %v2143_v23  ;;  %v2670_v27 = vld [vmem:[%s2006_s4 + $0x48] sm:$0xff] }
 0x207   : > { %v2675_v9 = vld [vmem:[%s2006_s4 + $0x28] sm:$0xff] }
 0x208   : > { %723 = vrot.lane.b32.xlu1 %v2590_v51, %s1876_s10  ;;  %691 = vrot.lane.b32.xlu0 %v2590_v51, %s1874_s7  ;;  %vm2609_vm7 = vcmp.eq.s32.totalorder %v731_v30, 1 }
 0x20c   : > { %725 = vrot.lane.b32.xlu1 %v2599_v33, %s1876_s10  ;;  %693 = vrot.lane.b32.xlu0 %v2599_v33, %s1874_s7 }
 0x23a   : > { %v696_v39 = vpop.permute.xlu1 %695  ;;  %v664_v32 = vpop.permute.xlu0 %663 }
 0x23b   : > { %v733_v62 = vsel %vm2609_vm7, %v664_v32, %v696_v39 }
 0x23c   : > { %v2616_v15 = vmax.f32 %v2462_v52, %v733_v62 }
 0x23e   : > { %v765_v4 = vsub.f32 %v2025_v1, %v2616_v15  ;;  %v698_v59 = vpop.permute.xlu1 %697  ;;  %v666_v40 = vpop.permute.xlu0 %665 }
 0x23f   : > { %v734_v23 = vsel %vm2609_vm7, %v666_v40, %v698_v59 }
 0x240   : > { %v781_v26 = vmul.f32 1.442695, %v765_v4  ;;  %v2623_v17 = vmax.f32 %v2471_v63, %v734_v23 }
 0x242   : > { %1578 = vpow2.f32 %v781_v26  ;;  %v766_v45 = vsub.f32 %v2032_v3, %v2623_v17  ;;  %v700_v21 = vpop.permute.xlu1 %699  ;;  %v668_v10 = vpop.permute.xlu0 %667 }
 0x243   : > { %v735_v52 = vsel %vm2609_vm7, %v668_v10, %v700_v21  ;;  %v2695_v10 = vld [vmem:[%s2006_s4 + $0x30] sm:$0xff] }
 0x244   : > { %v783_v46 = vmul.f32 1.442695, %v766_v45  ;;  %v2630_v1 = vmax.f32 %v2480_v54, %v735_v52  ;;  %v2690_v45 = vld [vmem:[%s2006_s4 + $0x50] sm:$0xff] }
 0x245   : > { %3214 = vst [vmem:[#allocation13_spill] sm:$0xff] %v2690_v45 }
 0x246   : > { %1580 = vpow2.f32 %v783_v46  ;;  %v767_v47 = vsub.f32 %v2041_v5, %v2630_v1  ;;  %v702_v49 = vpop.permute.xlu1 %701  ;;  %v670_v63 = vpop.permute.xlu0 %669 }
 0x247   : > { %v736_v29 = vsel %vm2609_vm7, %v670_v63, %v702_v49 }
 0x248   : > { %v785_v28 = vmul.f32 1.442695, %v767_v47  ;;  %v2637_v3 = vmax.f32 %v2490_v50, %v736_v29 }
 0x24a   : > { %1582 = vpow2.f32 %v785_v28  ;;  %v768_v11 = vsub.f32 %v2048_v6, %v2637_v3 }
 0x24c   : > { %v787_v56 = vmul.f32 1.442695, %v768_v11 }
 0x24e   : > { %1584 = vpow2.f32 %v787_v56 }
 0x24f   : > { %v1579_v54 = vpop.eup %1578 }
 0x250   : > { %878 = vmatmul.mubr.f32.vlgmr.msra.gmra.mxu0 %v1579_v54 }
 0x251   : > { %883 = vmatprep.mubr.f32.mxu0 %v1877_v16 }
 0x252   : > { %v680_v5 = vpop.permute.xlu1 %679  ;;  %v672_v60 = vpop.permute.xlu0 %671 }
 0x253   : > { %v1581_v13 = vpop.eup %1580 }
 0x254   : > { %884 = vmatmul.mubr.f32.gmra.mxu0 %v1581_v13 }
 0x255   : > { %889 = vmatprep.mubr.f32.mxu0 %v1877_v16 }
 0x256   : > { %v712_v38 = vpop.permute.xlu1 %711  ;;  %v704_v36 = vpop.permute.xlu0 %703 }
 0x257   : > { %v1583_v50 = vpop.eup %1582  ;;  %v741_v48 = vsel %vm2609_vm7, %v680_v5, %v712_v38  ;;  %v737_v6 = vsel %vm2609_vm7, %v672_v60, %v704_v36  ;;  %v2712_v60 = vld [vmem:[%s2006_s4 + $0x58] sm:$0xff] }
 0x258   : > { %v2648_v41 = vmax.f32 %v2505_v34, %v741_v48  ;;  %v2651_v0 = vmax.f32 %v2502_v58, %v737_v6  ;;  %890 = vmatmul.mubr.f32.gmra.mxu0 %v1583_v50  ;;  %3215 = vst [vmem:[#allocation14_spill] sm:$0xff] %v2712_v60  ;;  %v2717_v38 = vld [vmem:[%s2006_s4 + $0x38] sm:$0xff] }
 0x259   : > { %895 = vmatprep.mubr.f32.mxu0 %v1877_v16 }
 0x25a   : > { %v773_v2 = vsub.f32 %v2062_v8, %v2648_v41  ;;  %v769_v43 = vsub.f32 %v2055_v7, %v2651_v0  ;;  %v682_v18 = vpop.permute.xlu1 %681  ;;  %v674_v19 = vpop.permute.xlu0 %673 }
 0x25b   : > { %v1585_v20 = vpop.eup %1584 }
 0x25c   : > { %v797_v22 = vmul.f32 1.442695, %v773_v2  ;;  %v789_v34 = vmul.f32 1.442695, %v769_v43  ;;  %896 = vmatmul.mubr.f32.gmra.mxu0 %v1585_v20 }
 0x25d   : > { %901 = vmatprep.mubr.f32.mxu0 %v1877_v16 }
 0x25e   : > { %1586 = vpow2.f32 %v797_v22  ;;  %v714_v58 = vpop.permute.xlu1 %713  ;;  %v706_v12 = vpop.permute.xlu0 %705 }
 0x25f   : > { %1588 = vpow2.f32 %v789_v34  ;;  %v742_v8 = vsel %vm2609_vm7, %v682_v18, %v714_v58  ;;  %v738_v7 = vsel %vm2609_vm7, %v674_v19, %v706_v12  ;;  %v2728_v19 = vld [vmem:[%s2006_s4 + $0x60] sm:$0xff] }
 0x260   : > { %v2664_v57 = vmax.f32 %v2523_v44, %v742_v8  ;;  %v2667_v25 = vmax.f32 %v2520_v31, %v738_v7  ;;  %3217 = vst [vmem:[#allocation16_spill] sm:$0xff] %v2728_v19  ;;  %v2739_v8 = vld [vmem:[%s2006_s4 + $0x68] sm:$0xff] }
 0x261   : > { %3219 = vst [vmem:[#allocation18_spill] sm:$0xff] %v2739_v8 }
 0x262   : > { %v774_v37 = vsub.f32 %v2670_v27, %v2664_v57  ;;  %v770_v30 = vsub.f32 %v2675_v9, %v2667_v25  ;;  %v684_v39 = vpop.permute.xlu1 %683  ;;  %v676_v32 = vpop.permute.xlu0 %675 }
 0x264   : > { %v799_v62 = vmul.f32 1.442695, %v774_v37  ;;  %v791_v44 = vmul.f32 1.442695, %v770_v30 }
 0x266   : > { %1590 = vpow2.f32 %v799_v62  ;;  %v716_v4 = vpop.permute.xlu1 %715  ;;  %v708_v31 = vpop.permute.xlu0 %707 }
 0x267   : > { %1592 = vpow2.f32 %v791_v44  ;;  %v743_v59 = vsel %vm2609_vm7, %v684_v39, %v716_v4  ;;  %v739_v40 = vsel %vm2609_vm7, %v676_v32, %v708_v31 }
 0x268   : > { %v2684_v23 = vmax.f32 %v2541_v55, %v743_v59  ;;  %v2687_v26 = vmax.f32 %v2538_v53, %v739_v40 }
 0x26a   : > { %v775_v21 = vsub.f32 %v2690_v45, %v2684_v23  ;;  %v771_v52 = vsub.f32 %v2695_v10, %v2687_v26  ;;  %v686_v46 = vpop.permute.xlu1 %685  ;;  %v678_v47 = vpop.permute.xlu0 %677 }
 0x26b   : > { %v1587_v49 = vpop.eup %1586 }
 0x26c   : > { %v1589_v63 = vpop.eup %1588  ;;  %v801_v55 = vmul.f32 1.442695, %v775_v21  ;;  %v793_v29 = vmul.f32 1.442695, %v771_v52  ;;  %926 = vmatmul.mubr.f32.vlgmr.msra.gmra.mxu1 %v1587_v49 }
 0x26d   : > { %902 = vmatmul.mubr.f32.gmra.mxu0 %v1589_v63  ;;  %931 = vmatprep.mubr.f32.mxu1 %v1877_v16 }
 0x26e   : > { %1594 = vpow2.f32 %v801_v55  ;;  %v718_v53 = vpop.permute.xlu1 %717  ;;  %v710_v28 = vpop.permute.xlu0 %709  ;;  %907 = vmatprep.mubr.f32.mxu0 %v1877_v16 }
 0x26f   : > { %1596 = vpow2.f32 %v793_v29  ;;  %v744_v11 = vsel %vm2609_vm7, %v686_v46, %v718_v53  ;;  %v740_v56 = vsel %vm2609_vm7, %v678_v47, %v710_v28  ;;  %v2761_v46 = vld [vmem:[%s2006_s4 + $0x78] sm:$0xff]  ;;  %v337_v28 = vld [vmem:[%s2013_s29] sm:$0xff] }
 0x270   : > { %v2706_v54 = vmax.f32 %v2559_v35, %v744_v11  ;;  %v2709_v5 = vmax.f32 %v2556_v61, %v740_v56  ;;  %3223 = vst [vmem:[#allocation22_spill] sm:$0xff] %v2761_v46  ;;  %v341_v11 = vunpack.c.0.s8 %v337_v28  ;;  %v342_v56 = vunpack.c.1.s8 %v337_v28 }
 0x272   : > { %v776_v13 = vsub.f32 %v2712_v60, %v2706_v54  ;;  %v772_v36 = vsub.f32 %v2717_v38, %v2709_v5  ;;  %v720_v50 = vpop.permute.xlu1 %719  ;;  %v688_v48 = vpop.permute.xlu0 %687  ;;  %vm2770_vm8 = vcmp.eq.s32.totalorder %v341_v11, 1  ;;  %vm2774_vm9 = vcmp.eq.s32.totalorder %v341_v11, 2 }
 0x273   : > { %v1591_v6 = vpop.eup %1590  ;;  %v745_v35 = vsel %vm2609_vm7, %v688_v48, %v720_v50  ;;  %vm2778_vm10 = vcmp.eq.s32.totalorder %v342_v56, 1  ;;  %v1415_v48 = vsel %vm2770_vm8, 1.0, %v1877_v16  ;;  %vm2785_vm11 = vcmp.eq.s32.totalorder %v342_v56, 2  ;;  %v1688_v50 = vld [vmem:[%s2006_s4 + $0x20] sm:$0xff] }
 0x274   : > { %v1593_v2 = vpop.eup %1592  ;;  %v803_v61 = vmul.f32 1.442695, %v776_v13  ;;  %v795_v43 = vmul.f32 1.442695, %v772_v36  ;;  %v2724_v18 = vmax.f32 %v2572_v42, %v745_v35  ;;  %932 = vmatmul.mubr.f32.gmra.mxu1 %v1591_v6  ;;  %v1416_v35 = vsel %vm2778_vm10, 1.0, %v1877_v16  ;;  %v1686_v6 = vld [vmem:[%s2006_s4 + $0x10] sm:$0xff] }
 0x275   : > { %908 = vmatmul.mubr.f32.gmra.mxu0 %v1593_v2  ;;  %937 = vmatprep.mubr.f32.mxu1 %v1877_v16  ;;  %v343_v2 = vunpack.c.2.s8 %v337_v28 }
 0x276   : > { %3216 = vst [vmem:[#allocation15_spill] sm:$0xff] %v2724_v18  ;;  %1598 = vpow2.f32 %v803_v61  ;;  %v777_v20 = vsub.f32 %v2728_v19, %v2724_v18  ;;  %v722_v22 = vpop.permute.xlu1 %721  ;;  %v690_v34 = vpop.permute.xlu0 %689  ;;  %913 = vmatprep.mubr.f32.mxu0 %v1877_v16  ;;  %v1431_v61 = vsel %vm2774_vm9, 1.0, %v1877_v16 }
 0x277   : > { %1600 = vpow2.f32 %v795_v43  ;;  %v746_v58 = vsel %vm2609_vm7, %v690_v34, %v722_v22  ;;  %v1432_v43 = vsel %vm2785_vm11, 1.0, %v1877_v16  ;;  %vm2798_vm12 = vcmp.eq.s32.totalorder %v343_v2, 1 }
 0x278   : > { %v805_v42 = vmul.f32 1.442695, %v777_v20  ;;  %v2736_v12 = vmax.f32 %v2581_v24, %v746_v58  ;;  %v2750_v24 = vld [vmem:[%s2006_s4 + $0x70] sm:$0xff]  ;;  %v1191_v20 = vadd.f32 %v1416_v35, %v1415_v48  ;;  %v1271_v34 = vadd.f32 %v1432_v43, %v1431_v61 }
 0x279   : > { %3221 = vst [vmem:[#allocation20_spill] sm:$0xff] %v2750_v24  ;;  %vm2802_vm13 = vcmp.eq.s32.totalorder %v343_v2, 2  ;;  %v339_v35 = vld [vmem:[%s2013_s29 + $0x10] sm:$0xff]  ;;  %v3248_v43 = vmov 0 }
 0x27a   : > { %3218 = vst [vmem:[#allocation17_spill] sm:$0xff] %v2736_v12  ;;  %1602 = vpow2.f32 %v805_v42  ;;  %v778_v7 = vsub.f32 %v2739_v8, %v2736_v12  ;;  %v724_v37 = vpop.permute.xlu1 %723  ;;  %v692_v30 = vpop.permute.xlu0 %691  ;;  %v1417_v42 = vsel %vm2798_vm12, 1.0, %v1877_v16 }
 0x27b   : > { %v1595_v39 = vpop.eup %1594  ;;  %v747_v32 = vsel %vm2609_vm7, %v692_v30, %v724_v37  ;;  %v1433_v37 = vsel %vm2802_vm13, 1.0, %v1877_v16  ;;  %v338_v30 = vld [vmem:[%s2013_s29 + $0x8] sm:$0xff] }
 0x27c   : > { %v1597_v62 = vpop.eup %1596  ;;  %v807_v44 = vmul.f32 1.442695, %v778_v7  ;;  %v2746_v4 = vmax.f32 %v2590_v51, %v747_v32  ;;  %938 = vmatmul.mubr.f32.gmra.mxu1 %v1595_v39  ;;  %v344_v7 = vunpack.c.3.s8 %v337_v28  ;;  %v1192_v39 = vadd.f32 %v1417_v42, %v1191_v20 }
 0x27d   : > { %914 = vmatmul.mubr.f32.gmra.mxu0 %v1597_v62  ;;  %943 = vmatprep.mubr.f32.mxu1 %v1877_v16  ;;  %v1272_v62 = vadd.f32 %v1433_v37, %v1271_v34  ;;  %v347_v11 = vunpack.c.2.s8 %v338_v30  ;;  %v3250_v20 = vmov 0  ;;  %v348_v37 = vunpack.c.3.s8 %v338_v30 }
 0x27e   : > { %3220 = vst [vmem:[#allocation19_spill] sm:$0xff] %v2746_v4  ;;  %1604 = vpow2.f32 %v807_v44  ;;  %v779_v31 = vsub.f32 %v2750_v24, %v2746_v4  ;;  %v726_v59 = vpop.permute.xlu1 %725  ;;  %v694_v40 = vpop.permute.xlu0 %693  ;;  %919 = vmatprep.mubr.f32.mxu0 %v1877_v16  ;;  %vm2813_vm14 = vcmp.eq.s32.totalorder %v344_v7, 1  ;;  %vm2817_vm15 = vcmp.eq.s32.totalorder %v344_v7, 2 }
 0x27f   : > { %v748_v21 = vsel %vm2609_vm7, %v694_v40, %v726_v59  ;;  %v345_v59 = vunpack.c.0.s8 %v338_v30  ;;  %v1434_v40 = vsel %vm2817_vm15, 1.0, %v1877_v16  ;;  %vm2856_vm4 = vcmp.eq.s32.totalorder %v347_v11, 1 }
 0x280   : > { %v809_v52 = vmul.f32 1.442695, %v779_v31  ;;  %v2758_v51 = vmax.f32 %v2599_v33, %v748_v21  ;;  %v1418_v31 = vsel %vm2813_vm14, 1.0, %v1877_v16  ;;  %v3249_v43 = vsel %vm2856_vm4, 4294967295, %v3248_v43 }
 0x281   : > { %v1193_v21 = vadd.f32 %v1418_v31, %v1192_v39  ;;  %vm2827_vm0 = vcmp.eq.s32.totalorder %v345_v59, 1  ;;  %vm2831_vm1 = vcmp.eq.s32.totalorder %v345_v59, 2  ;;  %vm2860_vm5 = vcmp.eq.s32.totalorder %v347_v11, 2 }
 0x282   : > { %3222 = vst [vmem:[#allocation21_spill] sm:$0xff] %v2758_v51  ;;  %1606 = vpow2.f32 %v809_v52  ;;  %v780_v47 = vsub.f32 %v2761_v46, %v2758_v51  ;;  %v3240_v52 = vmov 0  ;;  %v3251_v20 = vsel %vm2860_vm5, 4294967295, %v3250_v20 }
 0x283   : > { %v1599_v49 = vpop.eup %1598  ;;  %v3241_v52 = vsel %vm2827_vm0, 4294967295, %v3240_v52  ;;  %v1421_v34 = vsel %vm2856_vm4, 1.0, %v1877_v16  ;;  %v1437_v42 = vsel %vm2860_vm5, 1.0, %v1877_v16  ;;  %v349_v7 = vunpack.c.0.s8 %v339_v35 }
 0x284   : > { %v1601_v63 = vpop.eup %1600  ;;  %v811_v55 = vmul.f32 1.442695, %v780_v47  ;;  %944 = vmatmul.mubr.f32.gmra.mxu1 %v1599_v49  ;;  %v1273_v47 = vadd.f32 %v1434_v40, %v1272_v62  ;;  %v350_v39 = vunpack.c.1.s8 %v339_v35  ;;  %vm2870_vm6 = vcmp.eq.s32.totalorder %v348_v37, 1 }
 0x285   : > { %920 = vmatmul.mubr.f32.gmra.mxu0 %v1601_v63  ;;  %949 = vmatprep.mubr.f32.mxu1 %v1877_v16  ;;  %v1419_v63 = vsel %vm2827_vm0, 1.0, %v1877_v16  ;;  %v3252_v59 = vmov 0  ;;  %vm2874_vm7 = vcmp.eq.s32.totalorder %v349_v7, 1  ;;  %v3254_v40 = vmov 0 }
 0x286   : > { %1608 = vpow2.f32 %v811_v55  ;;  %v346_v55 = vunpack.c.1.s8 %v338_v30  ;;  %v3253_v59 = vsel %vm2870_vm6, 4294967295, %v3252_v59  ;;  %v3255_v40 = vsel %vm2874_vm7, 4294967295, %v3254_v40 }
 0x287   : > { %v1603_v14 = vpop.eup %1602  ;;  %3256 = vst [vmem:[#allocation23_spill] sm:$0xff] %v3255_v40  ;;  %vm2882_vm4 = vcmp.eq.s32.totalorder %v348_v37, 2  ;;  %v1423_v30 = vsel %vm2874_vm7, 1.0, %v1877_v16  ;;  %vm2898_vm5 = vcmp.eq.s32.totalorder %v350_v39, 1  ;;  %vm2902_vm0 = vcmp.eq.s32.totalorder %v350_v39, 2 }
 0x288   : > { %950 = vmatmul.mubr.f32.gmra.mxu1 %v1603_v14  ;;  %v1435_v14 = vsel %vm2831_vm1, 1.0, %v1877_v16  ;;  %vm2841_vm2 = vcmp.eq.s32.totalorder %v346_v55, 1  ;;  %vm2845_vm3 = vcmp.eq.s32.totalorder %v346_v55, 2  ;;  %v3264_v11 = vmov 0 }
 0x289   : > { %955 = vmatprep.mubr.f32.mxu1 %v1877_v16  ;;  %v1420_v56 = vsel %vm2841_vm2, 1.0, %v1877_v16  ;;  %v1436_v48 = vsel %vm2845_vm3, 1.0, %v1877_v16  ;;  %v3265_v11 = vsel %vm2902_vm0, 4294967295, %v3264_v11  ;;  %v3270_v37 = vmov 0 }
 0x28a   : > { %3266 = vst [vmem:[#allocation25_spill] sm:$0xff] %v3265_v11  ;;  %v3273_v51 = vmov 0 }
 0x28b   : > { %v1605_v33 = vpop.eup %1604 }
 0x28c   : > { %956 = vmatmul.mubr.f32.gmra.mxu1 %v1605_v33  ;;  %v1194_v33 = vadd.f32 %v1419_v63, %v1193_v21 }
 0x28d   : > { %961 = vmatprep.mubr.f32.mxu1 %v1877_v16 }
 0x28e   : > { %v1195_v2 = vadd.f32 %v1420_v56, %v1194_v33  ;;  %v1438_v33 = vsel %vm2882_vm4, 1.0, %v1877_v16 }
 0x28f   : > { %v1607_v29 = vpop.eup %1606 }
 0x290   : > { %962 = vmatmul.mubr.f32.gmra.mxu1 %v1607_v29  ;;  %v1274_v29 = vadd.f32 %v1435_v14, %v1273_v47  ;;  %v1196_v62 = vadd.f32 %v1421_v34, %v1195_v2  ;;  %v351_v47 = vunpack.c.2.s8 %v339_v35  ;;  %v1422_v14 = vsel %vm2870_vm6, 1.0, %v1877_v16  ;;  %v340_v2 = vld [vmem:[%s2013_s29 + $0x18] sm:$0xff] }
 0x291   : > { %967 = vmatprep.mubr.f32.mxu1 %v1877_v16  ;;  %v1440_v34 = vsel %vm2902_vm0, 1.0, %v1877_v16 }
 0x292   : > { %v1275_v61 = vadd.f32 %v1436_v48, %v1274_v29  ;;  %v3261_v29 = vmov 0  ;;  %v1197_v56 = vadd.f32 %v1422_v14, %v1196_v62  ;;  %vm2913_vm7 = vcmp.eq.s32.totalorder %v351_v47, 1 }
 0x293   : > { %v1609_v53 = vpop.eup %1608  ;;  %v3262_v29 = vsel %vm2898_vm5, 4294967295, %v3261_v29  ;;  %vm2917_vm6 = vcmp.eq.s32.totalorder %v351_v47, 2  ;;  %v3276_v47 = vmov 0 }
 0x294   : > { %968 = vmatmul.mubr.f32.gmra.mxu1 %v1609_v53  ;;  %v3244_v53 = vmov 0  ;;  %v1276_v31 = vadd.f32 %v1437_v42, %v1275_v61  ;;  %3263 = vst [vmem:[#allocation24_spill] sm:$0xff] %v3262_v29  ;;  %v1424_v61 = vsel %vm2898_vm5, 1.0, %v1877_v16  ;;  %v352_v42 = vunpack.c.3.s8 %v339_v35 }
 0x295   : > { %v3245_v53 = vsel %vm2841_vm2, 4294967295, %v3244_v53  ;;  %vm2878_vm2 = vcmp.eq.s32.totalorder %v349_v7, 2  ;;  %v3267_v7 = vmov 0  ;;  %v3271_v37 = vsel %vm2917_vm6, 4294967295, %v3270_v37 }
 0x296   : > { %v1439_v55 = vsel %vm2878_vm2, 1.0, %v1877_v16  ;;  %v1277_v48 = vadd.f32 %v1438_v33, %v1276_v31  ;;  %v3268_v7 = vsel %vm2913_vm7, 4294967295, %v3267_v7  ;;  %3272 = vst [vmem:[#allocation27_spill] sm:$0xff] %v3271_v37  ;;  %v1198_v39 = vadd.f32 %v1423_v30, %v1197_v56 }
 0x297   : > { %3269 = vst [vmem:[#allocation26_spill] sm:$0xff] %v3268_v7  ;;  %v1425_v31 = vsel %vm2913_vm7, 1.0, %v1877_v16  ;;  %v1441_v14 = vsel %vm2917_vm6, 1.0, %v1877_v16  ;;  %v353_v33 = vunpack.c.0.s8 %v340_v2  ;;  %vm2927_vm5 = vcmp.eq.s32.totalorder %v352_v42, 1  ;;  %v1238_v7 = vld [vmem:[#allocation8 + $0x3] sm:$0x1] }
 0x298   : > { %v1278_v62 = vadd.f32 %v1439_v55, %v1277_v48  ;;  %v1199_v35 = vadd.f32 %v1424_v61, %v1198_v39  ;;  %v3274_v51 = vsel %vm2927_vm5, 4294967295, %v3273_v51  ;;  %vm2931_vm0 = vcmp.eq.s32.totalorder %v352_v42, 2 }
 0x299   : > { %3275 = vst [vmem:[#allocation28_spill] sm:$0xff] %v3274_v51  ;;  %v3277_v47 = vsel %vm2931_vm0, 4294967295, %v3276_v47  ;;  %v354_v30 = vunpack.c.1.s8 %v340_v2  ;;  %v1426_v55 = vsel %vm2927_vm5, 1.0, %v1877_v16  ;;  %v1442_v48 = vsel %vm2931_vm0, 1.0, %v1877_v16 }
 0x29a   : > { %v1279_v46 = vadd.f32 %v1440_v34, %v1278_v62  ;;  %3278 = vst [vmem:[#allocation29_spill] sm:$0xff] %v3277_v47  ;;  %v1200_v56 = vadd.f32 %v1425_v31, %v1199_v35  ;;  %vm2941_vm7 = vcmp.eq.s32.totalorder %v353_v33, 1  ;;  %v3279_v34 = vmov 0 }
 0x29b   : > { %v3280_v34 = vsel %vm2941_vm7, 4294967295, %v3279_v34  ;;  %vm2945_vm6 = vcmp.eq.s32.totalorder %v353_v33, 2  ;;  %v3282_v42 = vmov 0  ;;  %v355_v39 = vunpack.c.2.s8 %v340_v2 }
 0x29c   : > { %v1280_v61 = vadd.f32 %v1441_v14, %v1279_v46  ;;  %3281 = vst [vmem:[#allocation30_spill] sm:$0xff] %v3280_v34  ;;  %v3283_v42 = vsel %vm2945_vm6, 4294967295, %v3282_v42  ;;  %v1201_v62 = vadd.f32 %v1426_v55, %v1200_v56  ;;  %v1427_v31 = vsel %vm2941_vm7, 1.0, %v1877_v16 }
 0x29d   : > { %3284 = vst [vmem:[#allocation31_spill] sm:$0xff] %v3283_v42  ;;  %v1443_v35 = vsel %vm2945_vm6, 1.0, %v1877_v16  ;;  %vm2955_vm5 = vcmp.eq.s32.totalorder %v354_v30, 1  ;;  %v3285_v46 = vmov 0  ;;  %vm2959_vm0 = vcmp.eq.s32.totalorder %v354_v30, 2 }
 0x29e   : > { %v1281_v24 = vadd.f32 %v1442_v48, %v1280_v61  ;;  %v3286_v46 = vsel %vm2955_vm5, 4294967295, %v3285_v46  ;;  %v3288_v14 = vmov 0  ;;  %v356_v33 = vunpack.c.3.s8 %v340_v2 }
 0x29f   : > { %3287 = vst [vmem:[#allocation32_spill] sm:$0xff] %v3286_v46  ;;  %v3289_v14 = vsel %vm2959_vm0, 4294967295, %v3288_v14  ;;  %v1202_v8 = vadd.f32 %v1427_v31, %v1201_v62  ;;  %v1428_v56 = vsel %vm2955_vm5, 1.0, %v1877_v16  ;;  %v1444_v48 = vsel %vm2959_vm0, 1.0, %v1877_v16 }
 0x2a0   : > { %3290 = vst [vmem:[#allocation33_spill] sm:$0xff] %v3289_v14  ;;  %v1282_v55 = vadd.f32 %v1443_v35, %v1281_v24  ;;  %vm2969_vm7 = vcmp.eq.s32.totalorder %v355_v39, 1  ;;  %v3291_v61 = vmov 0  ;;  %vm2973_vm6 = vcmp.eq.s32.totalorder %v355_v39, 2 }
 0x2a1   : > { %v3292_v61 = vsel %vm2969_vm7, 4294967295, %v3291_v61  ;;  %v3294_v30 = vmov 0  ;;  %v1203_v34 = vadd.f32 %v1428_v56, %v1202_v8  ;;  %v1429_v24 = vsel %vm2969_vm7, 1.0, %v1877_v16 }
 0x2a2   : > { %3293 = vst [vmem:[#allocation34_spill] sm:$0xff] %v3292_v61  ;;  %v3295_v30 = vsel %vm2973_vm6, 4294967295, %v3294_v30  ;;  %v1283_v2 = vadd.f32 %v1444_v48, %v1282_v55  ;;  %v1445_v62 = vsel %vm2973_vm6, 1.0, %v1877_v16  ;;  %vm2983_vm5 = vcmp.eq.s32.totalorder %v356_v33, 1 }
 0x2a3   : > { %3296 = vst [vmem:[#allocation35_spill] sm:$0xff] %v3295_v30  ;;  %v3297_v31 = vmov 0  ;;  %v1204_v35 = vadd.f32 %v1429_v24, %v1203_v34  ;;  %vm2987_vm0 = vcmp.eq.s32.totalorder %v356_v33, 2  ;;  %v3300_v39 = vmov 0 }
 0x2a4   : > { %v3298_v31 = vsel %vm2983_vm5, 4294967295, %v3297_v31  ;;  %v1284_v46 = vadd.f32 %v1445_v62, %v1283_v2  ;;  %v3301_v39 = vsel %vm2987_vm0, 4294967295, %v3300_v39  ;;  %v1430_v8 = vsel %vm2983_vm5, 1.0, %v1877_v16 }
 0x2a5   : > { %3299 = vst [vmem:[#allocation36_spill] sm:$0xff] %v3298_v31  ;;  %3302 = vst [vmem:[#allocation37_spill] sm:$0xff] %v3301_v39  ;;  %v1446_v55 = vsel %vm2987_vm0, 1.0, %v1877_v16  ;;  %v1205_v56 = vadd.f32 %v1430_v8, %v1204_v35  ;;  %v1158_v31 = vld [vmem:[#allocation8 + $0x1] sm:$0x1] }
 0x2a6   : > { %v1285_v48 = vadd.f32 %v1446_v55, %v1284_v46 }
 0x2a7   : > { %v1206_v61 = vrot.slane %v1205_v56, 4 }
 0x2a8   : > { %v1286_v30 = vrot.slane %v1285_v48, 4 }
 0x2a9   : > { %v1207_v14 = vadd.f32 %v1206_v61, %v1205_v56 }
 0x2aa   : > { %v1287_v51 = vadd.f32 %v1286_v30, %v1285_v48 }
 0x2ab   : > { %v1208_v34 = vrot.slane %v1207_v14, 2 }
 0x2ac   : > { %v1288_v2 = vrot.slane %v1287_v51, 2 }
 0x2ad   : > { %v1209_v33 = vadd.f32 %v1208_v34, %v1207_v14 }
 0x2ae   : > { %v1289_v24 = vadd.f32 %v1288_v2, %v1287_v51 }
 0x2af   : > { %v1210_v4 = vrot.slane %v1209_v33, 1 }
 0x2b0   : > { %v1290_v62 = vrot.slane %v1289_v24, 1 }
 0x2b1   : > { %v1211_v19 = vadd.f32 %v1210_v4, %v1209_v33 }
 0x2b2   : > { %v1291_v42 = vadd.f32 %v1290_v62, %v1289_v24 }
 0x2b3   : > { %v1212_v47 = vadd.f32 %v1211_v19, %v1158_v31 }
 0x2b4   : > { %v1292_v12 = vadd.f32 %v1291_v42, %v1238_v7 }
 0x2b5   : > { %1213 = vst [vmem:[#allocation8 + $0x1] sm:$0x1] %v1212_v47 }
 0x2b6   : > { %1293 = vst [vmem:[#allocation8 + $0x3] sm:$0x1] %v1292_v12 }
 0x310   : > { %v879_v16 = vpop.f32.mrf.mxu0 }
 0x311   : > { %1610 = vlog2.f32 %v879_v16 }
 0x312   : > { %v881_v46 = vpop.f32.mrf.mxu0 }
 0x314   : > { %v885_v35 = vpop.f32.mrf.mxu0 }
 0x315   : > { %1612 = vlog2.f32 %v885_v35 }
 0x316   : > { %v887_v8 = vpop.f32.mrf.mxu0 }
 0x318   : > { %v891_v61 = vpop.f32.mrf.mxu0 }
 0x319   : > { %1614 = vlog2.f32 %v891_v61 }
 0x31a   : > { %v893_v30 = vpop.f32.mrf.mxu0  ;;  %1616 = vrcp.f32 %v885_v35 }
 0x31c   : > { %v897_v55 = vpop.f32.mrf.mxu0 }
 0x31d   : > { %1618 = vlog2.f32 %v897_v55 }
 0x31e   : > { %v2997_v56 = vpop.f32.mrf.mxu0  ;;  %1620 = vrcp.f32 %v879_v16  ;;  %v1611_v42 = vpop.eup %1610 }
 0x31f   : > { %v975_v33 = vmul.f32 0.6931472, %v1611_v42 }
 0x321   : > { %v1006_v39 = vadd.f32 %v975_v33, %v2616_v15 }
 0x322   : > { %v1613_v31 = vpop.eup %1612 }
 0x323   : > { %v977_v16 = vmul.f32 0.6931472, %v1613_v31 }
 0x325   : > { %v1007_v42 = vadd.f32 %v977_v16, %v2623_v17 }
 0x326   : > { %v1615_v2 = vpop.eup %1614 }
 0x327   : > { %v1617_v62 = vpop.eup %1616 }
 0x328   : > { %v1103_v60 = vmul.f32 %v1617_v62, %v887_v8 }
 0x32a   : > { %v1619_v35 = vpop.eup %1618  ;;  %v1119_v17 = vsel %vm2785_vm11, %v1103_v60, 0.0  ;;  %vm3306_vm11 = vnez %v3249_v43 }
 0x32b   : > { %v981_v37 = vmul.f32 0.6931472, %v1619_v35  ;;  %v1685_v35 = vld [vmem:[%s2006_s4 + $0x8] sm:$0xff] }
 0x32c   : > { %v927_v4 = vpop.f32.mrf.mxu1  ;;  %v1071_v11 = vsub.f32 %v1007_v42, %v1685_v35 }
 0x32d   : > { %v903_v51 = vpop.f32.mrf.mxu0 }
 0x32e   : > { %1622 = vlog2.f32 %v903_v51  ;;  %v3001_v7 = vpop.f32.mrf.mxu1 }
 0x32f   : > { %v2999_v19 = vpop.f32.mrf.mxu0  ;;  %1624 = vrcp.f32 %v891_v61  ;;  %v1621_v61 = vpop.eup %1620 }
 0x330   : > { %1626 = vrcp.f32 %v897_v55  ;;  %v979_v55 = vmul.f32 0.6931472, %v1615_v2  ;;  %v1102_v45 = vmul.f32 %v1621_v61, %v881_v46  ;;  %v1009_v46 = vadd.f32 %v981_v37, %v2637_v3 }
 0x332   : > { %v1008_v40 = vadd.f32 %v979_v55, %v2630_v1  ;;  %v1118_v60 = vsel %vm2774_vm9, %v1102_v45, 0.0  ;;  %v1087_v45 = vsel %vm2778_vm10, %v1071_v11, 0.0  ;;  %vm3304_vm9 = vnez %v3251_v20 }
 0x333   : > { %v1215_v37 = vadd.f32 %v1119_v17, %v1118_v60  ;;  %vm3305_vm10 = vnez %v3245_v53  ;;  %v1689_v53 = vld [vmem:[%s2006_s4 + $0x40] sm:$0xff] }
 0x334   : > { %v933_v47 = vpop.f32.mrf.mxu1 }
 0x335   : > { %v909_v12 = vpop.f32.mrf.mxu0 }
 0x336   : > { %1628 = vlog2.f32 %v909_v12  ;;  %v3005_v48 = vpop.f32.mrf.mxu1 }
 0x337   : > { %1630 = vrcp.f32 %v903_v51  ;;  %v3003_v14 = vpop.f32.mrf.mxu0 }
 0x338   : > { %1632 = vrcp.f32 %v909_v12 }
 0x339   : > { %1634 = vlog2.f32 %v927_v4 }
 0x33b   : > { %v1623_v51 = vpop.eup %1622 }
 0x33c   : > { %v939_v24 = vpop.f32.mrf.mxu1  ;;  %v1625_v29 = vpop.eup %1624  ;;  %v983_v15 = vmul.f32 0.6931472, %v1623_v51 }
 0x33d   : > { %v915_v34 = vpop.f32.mrf.mxu0  ;;  %v1627_v31 = vpop.eup %1626  ;;  %v1104_v62 = vmul.f32 %v1625_v29, %v893_v30  ;;  %v1072_v29 = vsub.f32 %v1008_v40, %v1686_v6  ;;  %v1687_v40 = vld [vmem:[%s2006_s4 + $0x18] sm:$0xff] }
 0x33e   : > { %1636 = vlog2.f32 %v915_v34  ;;  %v3008_v12 = vpop.f32.mrf.mxu1  ;;  %v1105_v1 = vmul.f32 %v1627_v31, %v2997_v56  ;;  %v1010_v30 = vadd.f32 %v983_v15, %v2651_v0  ;;  %v1073_v0 = vsub.f32 %v1009_v46, %v1687_v40 }
 0x33f   : > { %1638 = vrcp.f32 %v915_v34  ;;  %v917_v18 = vpop.f32.mrf.mxu0  ;;  %v1120_v56 = vsel %vm2802_vm13, %v1104_v62, 0.0 }
 0x340   : > { %1640 = vlog2.f32 %v933_v47  ;;  %v1121_v31 = vsel %vm2817_vm15, %v1105_v1, 0.0  ;;  %v1074_v11 = vsub.f32 %v1010_v30, %v1688_v50 }
 0x341   : > { %1642 = vrcp.f32 %v927_v4  ;;  %v1684_v4 = vld [vmem:[%s2006_s4] sm:$0xff] }
 0x342   : > { %1644 = vrcp.f32 %v933_v47  ;;  %v1070_v33 = vsub.f32 %v1006_v39, %v1684_v4  ;;  %v1216_v4 = vadd.f32 %v1215_v37, %v1120_v56 }
 0x343   : > { %1646 = vlog2.f32 %v939_v24  ;;  %v1629_v2 = vpop.eup %1628 }
 0x344   : > { %v945_v34 = vpop.f32.mrf.mxu1  ;;  %v1631_v16 = vpop.eup %1630  ;;  %v985_v61 = vmul.f32 0.6931472, %v1629_v2  ;;  %v1086_v3 = vsel %vm2770_vm8, %v1070_v33, 0.0  ;;  %v1217_v22 = vadd.f32 %v1216_v4, %v1121_v31  ;;  %vm3303_vm8 = vnez %v3241_v52 }
 0x345   : > { %v921_v8 = vpop.f32.mrf.mxu0  ;;  %1648 = vlog2.f32 %v945_v34  ;;  %v1633_v55 = vpop.eup %1632  ;;  %v1135_v17 = vadd.f32 %v1087_v45, %v1086_v3 }
 0x346   : > { %1650 = vlog2.f32 %v921_v8  ;;  %v3015_v47 = vpop.f32.mrf.mxu1  ;;  %v1635_v51 = vpop.eup %1634  ;;  %v1011_v2 = vadd.f32 %v985_v61, %v2667_v25  ;;  %v1107_v58 = vmul.f32 %v1633_v55, %v3003_v14 }
 0x347   : > { %1652 = vrcp.f32 %v921_v8  ;;  %v1088_v8 = vsel %vm2798_vm12, %v1072_v29, 0.0  ;;  %v991_v35 = vmul.f32 0.6931472, %v1635_v51  ;;  %v923_v45 = vpop.f32.mrf.mxu0  ;;  %vm3307_vm12 = vnez %v3253_v59 }
 0x348   : > { %1654 = vrcp.f32 %v939_v24  ;;  %v951_v39 = vpop.f32.mrf.mxu1  ;;  %v1106_v24 = vmul.f32 %v1631_v16, %v2999_v19  ;;  %v1089_v16 = vsel %vm2813_vm14, %v1073_v0, 0.0  ;;  %v1136_v1 = vadd.f32 %v1135_v17, %v1088_v8 }
 0x349   : > { %1656 = vlog2.f32 %v951_v39  ;;  %v1075_v61 = vsub.f32 %v1011_v2, %v2675_v9  ;;  %v1123_v49 = vsel %vm2845_vm3, %v1107_v58, 0.0  ;;  %v1014_v51 = vadd.f32 %v991_v35, %v2648_v41 }
 0x34a   : > { %v3029_v42 = vpop.f32.mrf.mxu1  ;;  %1658 = vrcp.f32 %v945_v34  ;;  %v1122_v44 = vsel %vm2831_vm1, %v1106_v24, 0.0  ;;  %v1137_v6 = vadd.f32 %v1136_v1, %v1089_v16  ;;  %v3308_v16 = vld [vmem:[#allocation25_spill] sm:$0xff]  ;;  %v3310_v1 = vld [vmem:[#allocation23_spill] sm:$0xff] }
 0x34b   : > { %v1637_v36 = vpop.eup %1636  ;;  %1660 = vrcp.f32 %v951_v39  ;;  %v1091_v24 = vsel %vm3305_vm10, %v1075_v61, 0.0  ;;  %vm3309_vm13 = vnez %v3308_v16  ;;  %vm3311_vm14 = vnez %v3310_v1  ;;  %v3312_v61 = vld [vmem:[#allocation13_spill] sm:$0xff] }
 0x34c   : > { %v1639_v13 = vpop.eup %1638  ;;  %v987_v15 = vmul.f32 0.6931472, %v1637_v36  ;;  %v957_v19 = vpop.f32.mrf.mxu1 }
 0x34d   : > { %1662 = vlog2.f32 %v957_v19  ;;  %v1641_v33 = vpop.eup %1640  ;;  %v1108_v25 = vmul.f32 %v1639_v13, %v917_v18  ;;  %v1218_v18 = vadd.f32 %v1217_v22, %v1122_v44 }
 0x34e   : > { %v1012_v34 = vadd.f32 %v987_v15, %v2687_v26  ;;  %v3044_v62 = vpop.f32.mrf.mxu1  ;;  %v1643_v14 = vpop.eup %1642  ;;  %1664 = vrcp.f32 %v957_v19  ;;  %v1090_v26 = vsel %vm3303_vm8, %v1074_v11, 0.0  ;;  %v993_v60 = vmul.f32 0.6931472, %v1641_v33 }
 0x34f   : > { %v1645_v46 = vpop.eup %1644  ;;  %v1124_v30 = vsel %vm3304_vm9, %v1108_v25, 0.0  ;;  %v1110_v3 = vmul.f32 %v1643_v14, %v3001_v7  ;;  %v1219_v52 = vadd.f32 %v1218_v18, %v1123_v49  ;;  %v1138_v56 = vadd.f32 %v1137_v6, %v1090_v26  ;;  %v3318_v6 = vld [vmem:[#allocation14_spill] sm:$0xff] }
 0x350   : > { %v963_v39 = vpop.f32.mrf.mxu1  ;;  %v1647_v55 = vpop.eup %1646  ;;  %v1076_v29 = vsub.f32 %v1012_v34, %v2695_v10  ;;  %v1015_v0 = vadd.f32 %v993_v60, %v2664_v57  ;;  %v1078_v15 = vsub.f32 %v1014_v51, %v1689_v53  ;;  %v1111_v8 = vmul.f32 %v1645_v46, %v3005_v48  ;;  %v3328_v53 = vld [vmem:[#allocation28_spill] sm:$0xff] }
 0x351   : > { %1666 = vlog2.f32 %v963_v39  ;;  %v995_v36 = vmul.f32 0.6931472, %v1647_v55  ;;  %v1220_v31 = vadd.f32 %v1219_v52, %v1124_v30  ;;  %v1139_v19 = vadd.f32 %v1138_v56, %v1091_v24  ;;  %v3314_v55 = vld [vmem:[#allocation27_spill] sm:$0xff]  ;;  %v3320_v52 = vld [vmem:[#allocation29_spill] sm:$0xff] }
 0x352   : > { %v1649_v32 = vpop.eup %1648  ;;  %1668 = vrcp.f32 %v963_v39  ;;  %v3056_v9 = vpop.f32.mrf.mxu1  ;;  %v1092_v7 = vsel %vm3306_vm11, %v1076_v29, 0.0  ;;  %v1079_v48 = vsub.f32 %v1015_v0, %v2670_v27  ;;  %v3313_v39 = vld [vmem:[#allocation15_spill] sm:$0xff]  ;;  %vm3315_vm15 = vnez %v3314_v55 }
 0x353   : > { %v1651_v28 = vpop.eup %1650  ;;  %v997_v58 = vmul.f32 0.6931472, %v1649_v32  ;;  %v1016_v50 = vadd.f32 %v995_v36, %v2684_v23  ;;  %v1140_v44 = vadd.f32 %v1139_v19, %v1092_v7  ;;  %v3316_v32 = vld [vmem:[#allocation24_spill] sm:$0xff]  ;;  %vm3329_vm8 = vnez %v3328_v53  ;;  %v3330_v19 = vld [vmem:[#allocation18_spill] sm:$0xff] }
 0x354   : > { %v1653_v37 = vpop.eup %1652  ;;  %v989_v10 = vmul.f32 0.6931472, %v1651_v28  ;;  %v969_v20 = vpop.f32.mrf.mxu1  ;;  %vm3317_vm1 = vnez %v3316_v32  ;;  %v3319_v28 = vld [vmem:[#allocation17_spill] sm:$0xff] }
 0x355   : > { %v1655_v40 = vpop.eup %1654  ;;  %v1109_v13 = vmul.f32 %v1653_v37, %v923_v45  ;;  %1670 = vlog2.f32 %v969_v20  ;;  %v1017_v63 = vadd.f32 %v997_v58, %v2706_v54  ;;  %v1080_v49 = vsub.f32 %v1016_v50, %v3312_v61  ;;  %v3331_v50 = vld [vmem:[#allocation33_spill] sm:$0xff] }
 0x356   : > { %v1657_v41 = vpop.eup %1656  ;;  %v1013_v2 = vadd.f32 %v989_v10, %v2709_v5  ;;  %1672 = vrcp.f32 %v969_v20  ;;  %v1126_v5 = vsel %vm2878_vm2, %v1110_v3, 0.0  ;;  %v1112_v34 = vmul.f32 %v1655_v40, %v3008_v12  ;;  %v3322_v10 = vld [vmem:[#allocation26_spill] sm:$0xff]  ;;  %v3324_v20 = vld [vmem:[#allocation16_spill] sm:$0xff] }
 0x357   : > { %v1125_v4 = vsel %vm2882_vm4, %v1109_v13, 0.0  ;;  %v1659_v57 = vpop.eup %1658  ;;  %v999_v43 = vmul.f32 0.6931472, %v1657_v41  ;;  %v1094_v12 = vsel %vm3311_vm14, %v1078_v15, 0.0  ;;  %v1081_v29 = vsub.f32 %v1017_v63, %v3318_v6  ;;  %v3327_v41 = vld [vmem:[#allocation19_spill] sm:$0xff] }
 0x358   : > { %v1077_v11 = vsub.f32 %v1013_v2, %v2717_v38  ;;  %v1221_v33 = vadd.f32 %v1220_v31, %v1125_v4  ;;  %v1661_v17 = vpop.eup %1660  ;;  %v1127_v38 = vsel %vm3309_vm13, %v1111_v8, 0.0  ;;  %v1113_v35 = vmul.f32 %v1659_v57, %v3015_v47  ;;  %v3325_v31 = vld [vmem:[#allocation31_spill] sm:$0xff] }
 0x359   : > { %v1018_v54 = vadd.f32 %v999_v43, %v3313_v39  ;;  %v1128_v59 = vsel %vm3315_vm15, %v1112_v34, 0.0  ;;  %v1114_v18 = vmul.f32 %v1661_v17, %v3029_v42  ;;  %v1095_v47 = vsel %vm3317_vm1, %v1079_v48, 0.0  ;;  %v971_v43 = vpop.f32.mrf.mxu1  ;;  %v3333_v17 = vld [vmem:[#allocation30_spill] sm:$0xff]  ;;  %v3335_v34 = vld [vmem:[#allocation20_spill] sm:$0xff] }
 0x35a   : > { %v1663_v25 = vpop.eup %1662  ;;  %v1093_v14 = vsel %vm3307_vm12, %v1077_v11, 0.0  ;;  %v1222_v23 = vadd.f32 %v1221_v33, %v1126_v5  ;;  %vm3321_vm2 = vnez %v3320_v52  ;;  %vm3323_vm3 = vnez %v3322_v10 }
 0x35b   : > { %v1141_v22 = vadd.f32 %v1140_v44, %v1093_v14  ;;  %v1001_v21 = vmul.f32 0.6931472, %v1663_v25  ;;  %v1665_v46 = vpop.eup %1664  ;;  %v1129_v37 = vsel %vm3321_vm2, %v1113_v35, 0.0  ;;  %v1096_v42 = vsel %vm3323_vm3, %v1080_v49, 0.0 }
 0x35c   : > { %v1223_v27 = vadd.f32 %v1222_v23, %v1127_v38  ;;  %v1115_v24 = vmul.f32 %v1665_v46, %v3044_v62  ;;  %v1082_v40 = vsub.f32 %v1018_v54, %v3324_v20  ;;  %vm3326_vm4 = vnez %v3325_v31  ;;  %v3337_v23 = vld [vmem:[#allocation21_spill] sm:$0xff]  ;;  %v3338_v38 = vld [vmem:[#allocation32_spill] sm:$0xff] }
 0x35d   : > { %v1142_v26 = vadd.f32 %v1141_v22, %v1094_v12  ;;  %v1019_v51 = vadd.f32 %v1001_v21, %v3319_v28  ;;  %v1130_v13 = vsel %vm3326_vm4, %v1114_v18, 0.0  ;;  %v1097_v15 = vsel %vm3329_vm8, %v1081_v29, 0.0  ;;  %v3341_v12 = vld [vmem:[#allocation22_spill] sm:$0xff] }
 0x35e   : > { %v1667_v60 = vpop.eup %1666  ;;  %v1224_v30 = vadd.f32 %v1223_v27, %v1128_v59  ;;  %vm3332_vm9 = vnez %v3331_v50  ;;  %vm3334_vm10 = vnez %v3333_v17  ;;  %vm3339_vm11 = vnez %v3338_v38 }
 0x35f   : > { %v1669_v3 = vpop.eup %1668  ;;  %v1143_v56 = vadd.f32 %v1142_v26, %v1095_v47  ;;  %v1003_v36 = vmul.f32 0.6931472, %v1667_v60  ;;  %v1083_v8 = vsub.f32 %v1019_v51, %v3330_v19  ;;  %v1131_v11 = vsel %vm3332_vm9, %v1115_v24, 0.0 }
 0x360   : > { %v1225_v45 = vadd.f32 %v1224_v30, %v1129_v37  ;;  %v1116_v2 = vmul.f32 %v1669_v3, %v3056_v9  ;;  %v1098_v5 = vsel %vm3334_vm10, %v1082_v40, 0.0  ;;  %v1214_v3 = vld [vmem:[#allocation8 + $0x2] sm:$0x1] }
 0x361   : > { %v1144_v0 = vadd.f32 %v1143_v56, %v1096_v42  ;;  %v1020_v7 = vadd.f32 %v1003_v36, %v3327_v41  ;;  %v1099_v22 = vsel %vm3339_vm11, %v1083_v8, 0.0  ;;  %v1134_v56 = vld [vmem:[#allocation8] sm:$0x1] }
 0x362   : > { %v1671_v58 = vpop.eup %1670  ;;  %v1226_v62 = vadd.f32 %v1225_v45, %v1130_v13  ;;  %v1132_v14 = vsel %vm2973_vm6, %v1116_v2, 0.0 }
 0x363   : > { %v1673_v4 = vpop.eup %1672  ;;  %v1145_v57 = vadd.f32 %v1144_v0, %v1097_v15  ;;  %v1005_v33 = vmul.f32 0.6931472, %v1671_v58  ;;  %v1084_v9 = vsub.f32 %v1020_v7, %v3335_v34 }
 0x364   : > { %v1227_v44 = vadd.f32 %v1226_v62, %v1131_v11  ;;  %v1117_v25 = vmul.f32 %v1673_v4, %v971_v43 }
 0x365   : > { %v1146_v48 = vadd.f32 %v1145_v57, %v1098_v5  ;;  %v1021_v16 = vadd.f32 %v1005_v33, %v3337_v23  ;;  %v1100_v27 = vsel %vm2969_vm7, %v1084_v9, 0.0 }
 0x366   : > { %v1228_v35 = vadd.f32 %v1227_v44, %v1132_v14  ;;  %v1133_v46 = vsel %vm2987_vm0, %v1117_v25, 0.0 }
 0x367   : > { %v1147_v1 = vadd.f32 %v1146_v48, %v1099_v22  ;;  %v1085_v61 = vsub.f32 %v1021_v16, %v3341_v12 }
 0x368   : > { %v1229_v39 = vadd.f32 %v1228_v35, %v1133_v46 }
 0x369   : > { %v1148_v54 = vadd.f32 %v1147_v1, %v1100_v27  ;;  %v1101_v59 = vsel %vm2983_vm5, %v1085_v61, 0.0 }
 0x36a   : > { %v1230_v26 = vrot.slane %v1229_v39, 4 }
 0x36b   : > { %v1149_v18 = vadd.f32 %v1148_v54, %v1101_v59 }
 0x36c   : > { %v1231_v60 = vadd.f32 %v1230_v26, %v1229_v39 }
 0x36d   : > { %v1150_v32 = vrot.slane %v1149_v18, 4 }
 0x36e   : > { %v1232_v47 = vrot.slane %v1231_v60, 2 }
 0x36f   : > { %v1151_v6 = vadd.f32 %v1150_v32, %v1149_v18 }
 0x370   : > { %v1233_v29 = vadd.f32 %v1232_v47, %v1231_v60 }
 0x371   : > { %v1152_v30 = vrot.slane %v1151_v6, 2 }
 0x372   : > { %v1234_v28 = vrot.slane %v1233_v29, 1 }
 0x373   : > { %v1153_v51 = vadd.f32 %v1152_v30, %v1151_v6 }
 0x374   : > { %v1235_v52 = vadd.f32 %v1234_v28, %v1233_v29 }
 0x375   : > { %v1154_v37 = vrot.slane %v1153_v51, 1 }
 0x376   : > { %v1236_v24 = vadd.f32 %v1235_v52, %v1214_v3 }
 0x377   : > { %v1155_v36 = vadd.f32 %v1154_v37, %v1153_v51 }
 0x378   : > { %1237 = vst [vmem:[#allocation8 + $0x2] sm:$0x1] %v1236_v24 }
 0x379   : > { %v1156_v10 = vadd.f32 %v1155_v36, %v1134_v56 }
 0x37b   : > { %1157 = vst [vmem:[#allocation8] sm:$0x1] %v1156_v10 }
 0x37c   : > { %1785 = shalt.err (!%p1782_p11)
}
 0x37d   : > { %1494 = dma.vmem_to_hbm [thread:$0]  (%p1511_p1), %s1304_s26, 64, %s3156_s3, [#allocation4]  }
 0x37e   : > { %1833 = dma.done.wait (%p1511_p1), [#allocation4], 64  }
 0x37f   : > { %1835 = vsyncadd (%p1511_p1), [#allocation4], 4294967232 }
 0x380 PF: > { %s20_s17 = sadd.s32 1, %s1858_s17   ;;  %s3344_s12 = smov %s1842_s13 }
 0x381   : > { %p17_p13 = scmp.ge.s32.totalorder %s20_s17, 7   ;;  %s3345_s13 = smov %s1846_s14 }
 0x382   : > { %s3346_s14 = smov %s1975_s8  ;;  %s3347_s15 = smov %s1854_s16 }
 0x383   : > { %s3348_s16 = smov %s3350_s24  ;;  %19 = sbr.rel (!%p17_p13) target bundleno = 10 (0xa), region = 91 }
 0x388   :  { %1316 = vsyncpa [#allocation3], 1 }
 0x389   :  { %1318 = vsyncpa [#allocation3 + $0x1], 1 }
 0x38a   :  { %1319 = vsyncpa [#allocation6], 1 }
 0x38b   :  { %1321 = vsyncpa [#allocation6 + $0x1], 1 }
 0x38c   :  { %1322 = vsyncpa [#allocation4], 1 }
 0x38d   :  { %1324 = vsyncpa [#allocation4 + $0x1], 1 }

</bundles_post_ra>
